<compile_context>
chip_gen: v7x
topology: tpu7x:2x2x1
jax: 0.10.0
libtpu: 0.0.40
codegen_flags: <defaults>
</compile_context>

<pallas_src>
import jax
import jax.numpy as jnp
from jax.experimental import pallas as pl
from jax.experimental.pallas import tpu as pltpu


def _softplus(x):
    # matches torch.nn.Softplus(beta=1, threshold=20)
    return jnp.where(x > 20.0, x, jnp.log1p(jnp.exp(jnp.minimum(x, 20.0))))


def lstm_encoder_kernel(x_ref, wcs_ref, bf_ref, wih_ref, whh_ref, bg_ref,
                        wcls_ref, wpc_ref, bcls_ref,
                        out_ref,
                        xp_scr, h_scr, c_scr, s_scr):
    CT, B, C = out_ref.shape            # timesteps in this chunk, batch, classes
    H = whh_ref.shape[0]

    # ---- carried recurrent state: zero only on the very first chunk --------
    @pl.when(pl.program_id(0) == 0)
    def _():
        h_scr[...] = jnp.zeros_like(h_scr)
        c_scr[...] = jnp.zeros_like(c_scr)
        s_scr[...] = jnp.zeros_like(s_scr)

    # ---- Phase 1: bulk input projection for the whole chunk (MXU work) -----
    # TODO(synk): build_feature_extractor(args) is undefined in the source
    # module; approximated as a linear camera+sensor fusion followed by ReLU.
    fusion = jnp.maximum(
        jnp.dot(x_ref[...], wcs_ref[...], preferred_element_type=jnp.float32)
        + bf_ref[...],
        0.0)                                                    # (CT*B, FUSION)
    xp_scr[...] = (jnp.dot(fusion, wih_ref[...],
                           preferred_element_type=jnp.float32)
                   + bg_ref[...])                               # (CT*B, 4H)

    # Loop-invariant weights / biases: load & broadcast once, not per step.
    whh = whh_ref[...]                                          # (H, 4H)
    wcls = wcls_ref[...]                                        # (H, C)
    wpc = wpc_ref[...]                                          # (C, C)
    bcls = jnp.broadcast_to(bcls_ref[...], (B, C))              # (B, C)

    # ---- Phase 2: serial recurrence (the only true data dependency) --------
    @pl.loop(0, CT, unroll=True)
    def _(t):
        row = pl.multiple_of(t * B, B)
        gates = (xp_scr[pl.ds(row, B), :]
                 + jnp.dot(h_scr[...], whh,
                           preferred_element_type=jnp.float32))  # (B, 4H)
        # PyTorch LSTMCell gate order: i, f, g, o
        i_g = jax.nn.sigmoid(gates[:, 0 * H:1 * H])
        f_g = jax.nn.sigmoid(gates[:, 1 * H:2 * H])
        g_g = jnp.tanh(gates[:, 2 * H:3 * H])
        o_g = jax.nn.sigmoid(gates[:, 3 * H:4 * H])
        c_new = f_g * c_scr[...] + i_g * g_g
        h_new = o_g * jnp.tanh(c_new)

        # (h + s @ wprm) @ wcls  ==  h @ wcls + s @ (wprm @ wcls)
        logits = (jnp.dot(h_new, wcls, preferred_element_type=jnp.float32)
                  + jnp.dot(s_scr[...], wpc, preferred_element_type=jnp.float32)
                  + bcls)                                        # (B, C)
        alpha = _softplus(logits)
        # Dirichlet(alpha).mean == alpha / alpha.sum(-1, keepdims=True)
        score = alpha / jnp.sum(alpha, axis=-1, keepdims=True)

        h_scr[...] = h_new
        c_scr[...] = c_new
        s_scr[...] = score
        out_ref[t] = score


def baseline_lstm_forward(camera_inputs, sensor_inputs, params, *, chunk_t=None):
    """camera_inputs: (B, T, Fc); sensor_inputs: (B, T, Fs). Returns (B*T, C)."""
    wc, ws, bf, wih, whh, bg, wprm, wcls, bcls = params
    B, T, Fc = camera_inputs.shape
    Fs = sensor_inputs.shape[2]
    H = whh.shape[0]
    C = wcls.shape[1]

    if chunk_t is None:
        chunk_t = T
    assert T % chunk_t == 0, "enc_steps must be divisible by the time chunk"
    n_chunks = T // chunk_t

    # Fuse the camera and sensor projections into one matmul (concat features,
    # stack weights) and flatten to time-major rows for the bulk projection.
    xin = jnp.concatenate(
        [camera_inputs.astype(jnp.float32), sensor_inputs.astype(jnp.float32)],
        axis=-1)                                      # (B, T, Fc+Fs)
    xin_tm = jnp.transpose(xin, (1, 0, 2)).reshape(T * B, Fc + Fs)
    wcs = jnp.concatenate([wc, ws], axis=0)           # (Fc+Fs, FUSION)
    # Algebraic shortening of the score-feedback path.
    wpc = (wprm @ wcls).astype(jnp.float32)           # (C, C)

    def full_spec(arr):
        # Constant block index -> stays resident in VMEM across grid steps.
        return pl.BlockSpec(arr.shape, lambda i, _nd=arr.ndim: (0,) * _nd)

    operands = (xin_tm, wcs, bf, wih, whh, bg, wcls, wpc, bcls)

    in_specs = [pl.BlockSpec((chunk_t * B, Fc + Fs), lambda i: (i, 0))]
    in_specs += [full_spec(a) for a in operands[1:]]

    out = pl.pallas_call(
        lstm_encoder_kernel,
        out_shape=jax.ShapeDtypeStruct((T, B, C), jnp.float32),
        grid=(n_chunks,),
        in_specs=in_specs,
        out_specs=pl.BlockSpec((chunk_t, B, C), lambda i: (i, 0, 0)),
        scratch_shapes=[
            pltpu.VMEM((chunk_t * B, 4 * H), jnp.float32),  # hoisted gate proj.
            pltpu.VMEM((B, H), jnp.float32),                # enc_hx (carried)
            pltpu.VMEM((B, H), jnp.float32),                # enc_cx (carried)
            pltpu.VMEM((B, C), jnp.float32),                # enc_score (carried)
        ],
        compiler_params=pltpu.CompilerParams(
            dimension_semantics=("arbitrary",)),
    )(*operands)

    # (T, B, C) -> (B, T, C) -> (B*T, C)  == torch.stack(dim=1).view(-1, C)
    return jnp.transpose(out, (1, 0, 2)).reshape(-1, C)


def reference_forward(camera_inputs, sensor_inputs, params):
    """Pure-JAX reference (mirrors the PyTorch module structure exactly)."""
    wc, ws, bf, wih, whh, bg, wprm, wcls, bcls = params
    B, T, _ = camera_inputs.shape
    H = whh.shape[0]
    C = wcls.shape[1]
    h = jnp.zeros((B, H), jnp.float32)
    c = jnp.zeros((B, H), jnp.float32)
    s = jnp.zeros((B, C), jnp.float32)
    outs = []
    for t in range(T):
        cam = camera_inputs[:, t].astype(jnp.float32)
        sen = sensor_inputs[:, t].astype(jnp.float32)
        fusion = jnp.maximum(cam @ wc + sen @ ws + bf, 0.0)
        gates = fusion @ wih + h @ whh + bg
        i_g = jax.nn.sigmoid(gates[:, 0 * H:1 * H])
        f_g = jax.nn.sigmoid(gates[:, 1 * H:2 * H])
        g_g = jnp.tanh(gates[:, 2 * H:3 * H])
        o_g = jax.nn.sigmoid(gates[:, 3 * H:4 * H])
        c = f_g * c + i_g * g_g
        h = o_g * jnp.tanh(c)
        hx_enc = h + s @ wprm
        alpha = _softplus(hx_enc @ wcls + bcls)
        s = alpha / jnp.sum(alpha, axis=-1, keepdims=True)
        outs.append(s)
    return jnp.stack(outs, axis=1).reshape(-1, C)


if __name__ == "__main__":
    # Small shapes consistent with the module's forward:
    B, T = 2, 8              # batch, enc_steps
    Fc, Fs = 16, 8           # camera / sensor feature sizes
    FUSION = 32              # fusion_size
    H = 32                   # hidden_size
    C = 8                    # num_classes

    key = jax.random.PRNGKey(0)
    ks = jax.random.split(key, 12)

    wc   = 0.1 * jax.random.normal(ks[0], (Fc, FUSION), jnp.float32)
    ws   = 0.1 * jax.random.normal(ks[1], (Fs, FUSION), jnp.float32)
    bf   = 0.1 * jax.random.normal(ks[2], (1, FUSION), jnp.float32)
    wih  = 0.1 * jax.random.normal(ks[3], (FUSION, 4 * H), jnp.float32)
    whh  = 0.1 * jax.random.normal(ks[4], (H, 4 * H), jnp.float32)
    bg   = 0.1 * jax.random.normal(ks[5], (1, 4 * H), jnp.float32)   # b_ih + b_hh
    wprm = 0.1 * jax.random.normal(ks[6], (C, H), jnp.float32)       # self.weight
    wcls = 0.1 * jax.random.normal(ks[7], (H, C), jnp.float32)       # classifier W^T
    bcls = 0.1 * jax.random.normal(ks[8], (1, C), jnp.float32)
    params = (wc, ws, bf, wih, whh, bg, wprm, wcls, bcls)

    camera_inputs = jax.random.normal(ks[9], (B, T, Fc), jnp.float32)
    sensor_inputs = jax.random.normal(ks[10], (B, T, Fs), jnp.float32)

    # chunk_t=4 -> 2 pipelined time chunks; recurrent state carried in scratch.
    scores = baseline_lstm_forward(camera_inputs, sensor_inputs, params, chunk_t=4)
    scores = jax.block_until_ready(scores)

    ref = reference_forward(camera_inputs, sensor_inputs, params)
    assert scores.shape == (B * T, C), scores.shape
    # Slightly relaxed tolerance: the kernel uses mathematically-equivalent but
    # re-associated matmuls (fused cam/sensor dot, wprm@wcls precomputation).
    assert jnp.allclose(scores, ref, atol=1e-4, rtol=1e-4), "mismatch vs reference"

    print("KERNEL_OK")
</pallas_src>

<mosaic_0001>
module attributes {stable_mosaic.version = 11 : i64} {
  func.func @lstm_encoder_kernel(%arg0: i32, %arg1: memref<8x24xf32, #tpu.memory_space<vmem>>, %arg2: memref<24x32xf32, #tpu.memory_space<vmem>>, %arg3: memref<1x32xf32, #tpu.memory_space<vmem>>, %arg4: memref<32x128xf32, #tpu.memory_space<vmem>>, %arg5: memref<32x128xf32, #tpu.memory_space<vmem>>, %arg6: memref<1x128xf32, #tpu.memory_space<vmem>>, %arg7: memref<32x8xf32, #tpu.memory_space<vmem>>, %arg8: memref<8x8xf32, #tpu.memory_space<vmem>>, %arg9: memref<1x8xf32, #tpu.memory_space<vmem>>, %arg10: memref<4x2x8xf32, #tpu.memory_space<vmem>>, %arg11: memref<8x128xf32, #tpu.memory_space<vmem>>, %arg12: memref<2x32xf32, #tpu.memory_space<vmem>>, %arg13: memref<2x32xf32, #tpu.memory_space<vmem>>, %arg14: memref<2x8xf32, #tpu.memory_space<vmem>>) attributes {dimension_semantics = [#tpu.dimension_semantics<arbitrary>], iteration_bounds = array<i64: 2>, scalar_prefetch = 0 : i64, scratch_operands = 4 : i64, tpu.core_type = #tpu.core_type<tc>, window_params = [{transform_indices = @transform_0, window_bounds = array<i64: 8, 24>}, {pipeline_mode = #tpu.pipeline_mode<synchronous>, transform_indices = @transform_1, window_bounds = array<i64: 24, 32>}, {pipeline_mode = #tpu.pipeline_mode<synchronous>, transform_indices = @transform_2, window_bounds = array<i64: 1, 32>}, {pipeline_mode = #tpu.pipeline_mode<synchronous>, transform_indices = @transform_3, window_bounds = array<i64: 32, 128>}, {pipeline_mode = #tpu.pipeline_mode<synchronous>, transform_indices = @transform_4, window_bounds = array<i64: 32, 128>}, {pipeline_mode = #tpu.pipeline_mode<synchronous>, transform_indices = @transform_5, window_bounds = array<i64: 1, 128>}, {pipeline_mode = #tpu.pipeline_mode<synchronous>, transform_indices = @transform_6, window_bounds = array<i64: 32, 8>}, {pipeline_mode = #tpu.pipeline_mode<synchronous>, transform_indices = @transform_7, window_bounds = array<i64: 8, 8>}, {pipeline_mode = #tpu.pipeline_mode<synchronous>, transform_indices = @transform_8, window_bounds = array<i64: 1, 8>}, {transform_indices = @transform_9, window_bounds = array<i64: 4, 2, 8>}]} {
    %c0_i32 = arith.constant 0 : i32
    %0 = arith.cmpi eq, %arg0, %c0_i32 : i32
    %1 = arith.extui %0 : i1 to i32
    %c0_i32_0 = arith.constant 0 : i32
    %2 = arith.cmpi ne, %1, %c0_i32_0 : i32
    scf.if %2 {
      %cst_131 = arith.constant 0.000000e+00 : f32
      %255 = vector.broadcast %cst_131 : f32 to vector<2x32xf32>
      %c0_132 = arith.constant 0 : index
      %c0_133 = arith.constant 0 : index
      %256 = vector.load %arg12[%c0_132, %c0_133] : memref<2x32xf32, #tpu.memory_space<vmem>>, vector<2x32xf32>
      tpu.vector_store %arg12[%c0_132, %c0_133], %255 {strides = array<i32>} : memref<2x32xf32, #tpu.memory_space<vmem>>, vector<2x32xf32>,
      %cst_134 = arith.constant 0.000000e+00 : f32
      %257 = vector.broadcast %cst_134 : f32 to vector<2x32xf32>
      %c0_135 = arith.constant 0 : index
      %c0_136 = arith.constant 0 : index
      %258 = vector.load %arg13[%c0_135, %c0_136] : memref<2x32xf32, #tpu.memory_space<vmem>>, vector<2x32xf32>
      tpu.vector_store %arg13[%c0_135, %c0_136], %257 {strides = array<i32>} : memref<2x32xf32, #tpu.memory_space<vmem>>, vector<2x32xf32>,
      %cst_137 = arith.constant 0.000000e+00 : f32
      %259 = vector.broadcast %cst_137 : f32 to vector<2x8xf32>
      %c0_138 = arith.constant 0 : index
      %c0_139 = arith.constant 0 : index
      %260 = vector.load %arg14[%c0_138, %c0_139] : memref<2x8xf32, #tpu.memory_space<vmem>>, vector<2x8xf32>
      tpu.vector_store %arg14[%c0_138, %c0_139], %259 {strides = array<i32>} : memref<2x8xf32, #tpu.memory_space<vmem>>, vector<2x8xf32>,
    } else {
    }
    %c0 = arith.constant 0 : index
    %c0_1 = arith.constant 0 : index
    %3 = vector.load %arg1[%c0, %c0_1] : memref<8x24xf32, #tpu.memory_space<vmem>>, vector<8x24xf32>
    %c0_2 = arith.constant 0 : index
    %c0_3 = arith.constant 0 : index
    %4 = vector.load %arg2[%c0_2, %c0_3] : memref<24x32xf32, #tpu.memory_space<vmem>>, vector<24x32xf32>
    %cst = arith.constant dense<0.000000e+00> : vector<8x32xf32>
    %5 = tpu.matmul %3, %4, %cst {dimension_numbers = #tpu.dot_dimension_numbers<[1], [0], [0], [1], [0, 0, 1, 1], [], []>} : vector<8x24xf32>, vector<24x32xf32>, vector<8x32xf32> -> vector<8x32xf32>
    %c0_4 = arith.constant 0 : index
    %c0_5 = arith.constant 0 : index
    %6 = vector.load %arg3[%c0_4, %c0_5] : memref<1x32xf32, #tpu.memory_space<vmem>>, vector<1x32xf32>
    %7 = vector.broadcast %6 : vector<1x32xf32> to vector<8x32xf32>
    %8 = arith.addf %5, %7 : vector<8x32xf32>
    %cst_6 = arith.constant 0.000000e+00 : f32
    %9 = vector.broadcast %cst_6 : f32 to vector<8x32xf32>
    %10 = arith.maximumf %8, %9 : vector<8x32xf32>
    %c0_7 = arith.constant 0 : index
    %c0_8 = arith.constant 0 : index
    %11 = vector.load %arg4[%c0_7, %c0_8] : memref<32x128xf32, #tpu.memory_space<vmem>>, vector<32x128xf32>
    %cst_9 = arith.constant dense<0.000000e+00> : vector<8x128xf32>
    %12 = tpu.matmul %10, %11, %cst_9 {dimension_numbers = #tpu.dot_dimension_numbers<[1], [0], [0], [1], [0, 0, 1, 1], [], []>} : vector<8x32xf32>, vector<32x128xf32>, vector<8x128xf32> -> vector<8x128xf32>
    %c0_10 = arith.constant 0 : index
    %c0_11 = arith.constant 0 : index
    %13 = vector.load %arg6[%c0_10, %c0_11] : memref<1x128xf32, #tpu.memory_space<vmem>>, vector<1x128xf32>
    %14 = vector.broadcast %13 : vector<1x128xf32> to vector<8x128xf32>
    %15 = arith.addf %12, %14 : vector<8x128xf32>
    %c0_12 = arith.constant 0 : index
    %c0_13 = arith.constant 0 : index
    %16 = vector.load %arg11[%c0_12, %c0_13] : memref<8x128xf32, #tpu.memory_space<vmem>>, vector<8x128xf32>
    tpu.vector_store %arg11[%c0_12, %c0_13], %15 {strides = array<i32>} : memref<8x128xf32, #tpu.memory_space<vmem>>, vector<8x128xf32>,
    %c0_14 = arith.constant 0 : index
    %c0_15 = arith.constant 0 : index
    %17 = vector.load %arg5[%c0_14, %c0_15] : memref<32x128xf32, #tpu.memory_space<vmem>>, vector<32x128xf32>
    %c0_16 = arith.constant 0 : index
    %c0_17 = arith.constant 0 : index
    %18 = vector.load %arg7[%c0_16, %c0_17] : memref<32x8xf32, #tpu.memory_space<vmem>>, vector<32x8xf32>
    %c0_18 = arith.constant 0 : index
    %c0_19 = arith.constant 0 : index
    %19 = vector.load %arg8[%c0_18, %c0_19] : memref<8x8xf32, #tpu.memory_space<vmem>>, vector<8x8xf32>
    %c0_20 = arith.constant 0 : index
    %c0_21 = arith.constant 0 : index
    %20 = vector.load %arg9[%c0_20, %c0_21] : memref<1x8xf32, #tpu.memory_space<vmem>>, vector<1x8xf32>
    %21 = vector.shape_cast %20 : vector<1x8xf32> to vector<1x8xf32>
    %22 = vector.broadcast %21 : vector<1x8xf32> to vector<2x8xf32>
    %c0_i32_22 = arith.constant 0 : i32
    %c1_i32 = arith.constant 1 : i32
    %23 = arith.muli %c0_i32_22, %c1_i32 : i32
    %c0_i32_23 = arith.constant 0 : i32
    %24 = arith.addi %c0_i32_23, %23 : i32
    %c2_i32 = arith.constant 2 : i32
    %25 = arith.muli %24, %c2_i32 : i32
    %26 = tpu.assume_multiple %25, 2 : i32
    %27 = arith.index_cast %26 : i32 to index
    %c0_24 = arith.constant 0 : index
    %28 = vector.load %arg11[%27, %c0_24] : memref<8x128xf32, #tpu.memory_space<vmem>>, vector<2x128xf32>
    %c0_25 = arith.constant 0 : index
    %c0_26 = arith.constant 0 : index
    %29 = vector.load %arg12[%c0_25, %c0_26] : memref<2x32xf32, #tpu.memory_space<vmem>>, vector<2x32xf32>
    %cst_27 = arith.constant dense<0.000000e+00> : vector<2x128xf32>
    %30 = tpu.matmul %29, %17, %cst_27 {dimension_numbers = #tpu.dot_dimension_numbers<[1], [0], [0], [1], [0, 0, 1, 1], [], []>} : vector<2x32xf32>, vector<32x128xf32>, vector<2x128xf32> -> vector<2x128xf32>
    %31 = arith.addf %28, %30 : vector<2x128xf32>
    %32 = vector.extract_strided_slice %31 {offsets = [0, 0], sizes = [2, 32], strides = [1, 1]} : vector<2x128xf32> to vector<2x32xf32>
    %33 = arith.negf %32 : vector<2x32xf32>
    %34 = math.exp %33 : vector<2x32xf32>
    %cst_28 = arith.constant 1.000000e+00 : f32
    %35 = vector.broadcast %cst_28 : f32 to vector<2x32xf32>
    %36 = arith.addf %35, %34 : vector<2x32xf32>
    %37 = arith.divf %35, %36 : vector<2x32xf32>
    %38 = vector.extract_strided_slice %31 {offsets = [0, 32], sizes = [2, 32], strides = [1, 1]} : vector<2x128xf32> to vector<2x32xf32>
    %39 = arith.negf %38 : vector<2x32xf32>
    %40 = math.exp %39 : vector<2x32xf32>
    %cst_29 = arith.constant 1.000000e+00 : f32
    %41 = vector.broadcast %cst_29 : f32 to vector<2x32xf32>
    %42 = arith.addf %41, %40 : vector<2x32xf32>
    %43 = arith.divf %41, %42 : vector<2x32xf32>
    %44 = vector.extract_strided_slice %31 {offsets = [0, 64], sizes = [2, 32], strides = [1, 1]} : vector<2x128xf32> to vector<2x32xf32>
    %45 = math.tanh %44 : vector<2x32xf32>
    %46 = vector.extract_strided_slice %31 {offsets = [0, 96], sizes = [2, 32], strides = [1, 1]} : vector<2x128xf32> to vector<2x32xf32>
    %47 = arith.negf %46 : vector<2x32xf32>
    %48 = math.exp %47 : vector<2x32xf32>
    %cst_30 = arith.constant 1.000000e+00 : f32
    %49 = vector.broadcast %cst_30 : f32 to vector<2x32xf32>
    %50 = arith.addf %49, %48 : vector<2x32xf32>
    %51 = arith.divf %49, %50 : vector<2x32xf32>
    %c0_31 = arith.constant 0 : index
    %c0_32 = arith.constant 0 : index
    %52 = vector.load %arg13[%c0_31, %c0_32] : memref<2x32xf32, #tpu.memory_space<vmem>>, vector<2x32xf32>
    %53 = arith.mulf %43, %52 : vector<2x32xf32>
    %54 = arith.mulf %37, %45 : vector<2x32xf32>
    %55 = arith.addf %53, %54 : vector<2x32xf32>
    %56 = math.tanh %55 : vector<2x32xf32>
    %57 = arith.mulf %51, %56 : vector<2x32xf32>
    %cst_33 = arith.constant dense<0.000000e+00> : vector<2x8xf32>
    %58 = tpu.matmul %57, %18, %cst_33 {dimension_numbers = #tpu.dot_dimension_numbers<[1], [0], [0], [1], [0, 0, 1, 1], [], []>} : vector<2x32xf32>, vector<32x8xf32>, vector<2x8xf32> -> vector<2x8xf32>
    %c0_34 = arith.constant 0 : index
    %c0_35 = arith.constant 0 : index
    %59 = vector.load %arg14[%c0_34, %c0_35] : memref<2x8xf32, #tpu.memory_space<vmem>>, vector<2x8xf32>
    %cst_36 = arith.constant dense<0.000000e+00> : vector<2x8xf32>
    %60 = tpu.matmul %59, %19, %cst_36 {dimension_numbers = #tpu.dot_dimension_numbers<[1], [0], [0], [1], [0, 0, 1, 1], [], []>} : vector<2x8xf32>, vector<8x8xf32>, vector<2x8xf32> -> vector<2x8xf32>
    %61 = arith.addf %58, %60 : vector<2x8xf32>
    %62 = arith.addf %61, %22 : vector<2x8xf32>
    %cst_37 = arith.constant 2.000000e+01 : f32
    %63 = vector.broadcast %cst_37 : f32 to vector<2x8xf32>
    %64 = arith.cmpf ogt, %62, %63 : vector<2x8xf32>
    %cst_38 = arith.constant 2.000000e+01 : f32
    %65 = vector.broadcast %cst_38 : f32 to vector<2x8xf32>
    %66 = arith.minimumf %62, %65 : vector<2x8xf32>
    %67 = math.exp %66 : vector<2x8xf32>
    %68 = math.log1p %67 : vector<2x8xf32>
    %69 = arith.select %64, %62, %68 : vector<2x8xi1>, vector<2x8xf32>
    %cst_39 = arith.constant dense<0.000000e+00> : vector<2xf32>
    %70 = vector.multi_reduction <add>, %69, %cst_39 [1] : vector<2x8xf32> to vector<2xf32>
    %71 = vector.shape_cast %70 : vector<2xf32> to vector<2x1xf32>
    %72 = vector.broadcast %71 : vector<2x1xf32> to vector<2x8xf32>
    %73 = arith.divf %69, %72 : vector<2x8xf32>
    %c0_40 = arith.constant 0 : index
    %c0_41 = arith.constant 0 : index
    %74 = vector.load %arg12[%c0_40, %c0_41] : memref<2x32xf32, #tpu.memory_space<vmem>>, vector<2x32xf32>
    tpu.vector_store %arg12[%c0_40, %c0_41], %57 {strides = array<i32>} : memref<2x32xf32, #tpu.memory_space<vmem>>, vector<2x32xf32>,
    %c0_42 = arith.constant 0 : index
    %c0_43 = arith.constant 0 : index
    %75 = vector.load %arg13[%c0_42, %c0_43] : memref<2x32xf32, #tpu.memory_space<vmem>>, vector<2x32xf32>
    tpu.vector_store %arg13[%c0_42, %c0_43], %55 {strides = array<i32>} : memref<2x32xf32, #tpu.memory_space<vmem>>, vector<2x32xf32>,
    %c0_44 = arith.constant 0 : index
    %c0_45 = arith.constant 0 : index
    %76 = vector.load %arg14[%c0_44, %c0_45] : memref<2x8xf32, #tpu.memory_space<vmem>>, vector<2x8xf32>
    tpu.vector_store %arg14[%c0_44, %c0_45], %73 {strides = array<i32>} : memref<2x8xf32, #tpu.memory_space<vmem>>, vector<2x8xf32>,
    %77 = arith.index_cast %24 : i32 to index
    %c0_46 = arith.constant 0 : index
    %c0_47 = arith.constant 0 : index
    %78 = vector.load %arg10[%77, %c0_46, %c0_47] : memref<4x2x8xf32, #tpu.memory_space<vmem>>, vector<1x2x8xf32>
    %79 = vector.shape_cast %78 : vector<1x2x8xf32> to vector<2x8xf32>
    %80 = vector.shape_cast %73 : vector<2x8xf32> to vector<1x2x8xf32>
    tpu.vector_store %arg10[%77, %c0_46, %c0_47], %80 {strides = array<i32>} : memref<4x2x8xf32, #tpu.memory_space<vmem>>, vector<1x2x8xf32>,
    %c1_i32_48 = arith.constant 1 : i32
    %c1_i32_49 = arith.constant 1 : i32
    %81 = arith.muli %c1_i32_48, %c1_i32_49 : i32
    %c0_i32_50 = arith.constant 0 : i32
    %82 = arith.addi %c0_i32_50, %81 : i32
    %c2_i32_51 = arith.constant 2 : i32
    %83 = arith.muli %82, %c2_i32_51 : i32
    %84 = tpu.assume_multiple %83, 2 : i32
    %85 = arith.index_cast %84 : i32 to index
    %c0_52 = arith.constant 0 : index
    %86 = vector.load %arg11[%85, %c0_52] : memref<8x128xf32, #tpu.memory_space<vmem>>, vector<2x128xf32>
    %c0_53 = arith.constant 0 : index
    %c0_54 = arith.constant 0 : index
    %87 = vector.load %arg12[%c0_53, %c0_54] : memref<2x32xf32, #tpu.memory_space<vmem>>, vector<2x32xf32>
    %cst_55 = arith.constant dense<0.000000e+00> : vector<2x128xf32>
    %88 = tpu.matmul %87, %17, %cst_55 {dimension_numbers = #tpu.dot_dimension_numbers<[1], [0], [0], [1], [0, 0, 1, 1], [], []>} : vector<2x32xf32>, vector<32x128xf32>, vector<2x128xf32> -> vector<2x128xf32>
    %89 = arith.addf %86, %88 : vector<2x128xf32>
    %90 = vector.extract_strided_slice %89 {offsets = [0, 0], sizes = [2, 32], strides = [1, 1]} : vector<2x128xf32> to vector<2x32xf32>
    %91 = arith.negf %90 : vector<2x32xf32>
    %92 = math.exp %91 : vector<2x32xf32>
    %cst_56 = arith.constant 1.000000e+00 : f32
    %93 = vector.broadcast %cst_56 : f32 to vector<2x32xf32>
    %94 = arith.addf %93, %92 : vector<2x32xf32>
    %95 = arith.divf %93, %94 : vector<2x32xf32>
    %96 = vector.extract_strided_slice %89 {offsets = [0, 32], sizes = [2, 32], strides = [1, 1]} : vector<2x128xf32> to vector<2x32xf32>
    %97 = arith.negf %96 : vector<2x32xf32>
    %98 = math.exp %97 : vector<2x32xf32>
    %cst_57 = arith.constant 1.000000e+00 : f32
    %99 = vector.broadcast %cst_57 : f32 to vector<2x32xf32>
    %100 = arith.addf %99, %98 : vector<2x32xf32>
    %101 = arith.divf %99, %100 : vector<2x32xf32>
    %102 = vector.extract_strided_slice %89 {offsets = [0, 64], sizes = [2, 32], strides = [1, 1]} : vector<2x128xf32> to vector<2x32xf32>
    %103 = math.tanh %102 : vector<2x32xf32>
    %104 = vector.extract_strided_slice %89 {offsets = [0, 96], sizes = [2, 32], strides = [1, 1]} : vector<2x128xf32> to vector<2x32xf32>
    %105 = arith.negf %104 : vector<2x32xf32>
    %106 = math.exp %105 : vector<2x32xf32>
    %cst_58 = arith.constant 1.000000e+00 : f32
    %107 = vector.broadcast %cst_58 : f32 to vector<2x32xf32>
    %108 = arith.addf %107, %106 : vector<2x32xf32>
    %109 = arith.divf %107, %108 : vector<2x32xf32>
    %c0_59 = arith.constant 0 : index
    %c0_60 = arith.constant 0 : index
    %110 = vector.load %arg13[%c0_59, %c0_60] : memref<2x32xf32, #tpu.memory_space<vmem>>, vector<2x32xf32>
    %111 = arith.mulf %101, %110 : vector<2x32xf32>
    %112 = arith.mulf %95, %103 : vector<2x32xf32>
    %113 = arith.addf %111, %112 : vector<2x32xf32>
    %114 = math.tanh %113 : vector<2x32xf32>
    %115 = arith.mulf %109, %114 : vector<2x32xf32>
    %cst_61 = arith.constant dense<0.000000e+00> : vector<2x8xf32>
    %116 = tpu.matmul %115, %18, %cst_61 {dimension_numbers = #tpu.dot_dimension_numbers<[1], [0], [0], [1], [0, 0, 1, 1], [], []>} : vector<2x32xf32>, vector<32x8xf32>, vector<2x8xf32> -> vector<2x8xf32>
    %c0_62 = arith.constant 0 : index
    %c0_63 = arith.constant 0 : index
    %117 = vector.load %arg14[%c0_62, %c0_63] : memref<2x8xf32, #tpu.memory_space<vmem>>, vector<2x8xf32>
    %cst_64 = arith.constant dense<0.000000e+00> : vector<2x8xf32>
    %118 = tpu.matmul %117, %19, %cst_64 {dimension_numbers = #tpu.dot_dimension_numbers<[1], [0], [0], [1], [0, 0, 1, 1], [], []>} : vector<2x8xf32>, vector<8x8xf32>, vector<2x8xf32> -> vector<2x8xf32>
    %119 = arith.addf %116, %118 : vector<2x8xf32>
    %120 = arith.addf %119, %22 : vector<2x8xf32>
    %cst_65 = arith.constant 2.000000e+01 : f32
    %121 = vector.broadcast %cst_65 : f32 to vector<2x8xf32>
    %122 = arith.cmpf ogt, %120, %121 : vector<2x8xf32>
    %cst_66 = arith.constant 2.000000e+01 : f32
    %123 = vector.broadcast %cst_66 : f32 to vector<2x8xf32>
    %124 = arith.minimumf %120, %123 : vector<2x8xf32>
    %125 = math.exp %124 : vector<2x8xf32>
    %126 = math.log1p %125 : vector<2x8xf32>
    %127 = arith.select %122, %120, %126 : vector<2x8xi1>, vector<2x8xf32>
    %cst_67 = arith.constant dense<0.000000e+00> : vector<2xf32>
    %128 = vector.multi_reduction <add>, %127, %cst_67 [1] : vector<2x8xf32> to vector<2xf32>
    %129 = vector.shape_cast %128 : vector<2xf32> to vector<2x1xf32>
    %130 = vector.broadcast %129 : vector<2x1xf32> to vector<2x8xf32>
    %131 = arith.divf %127, %130 : vector<2x8xf32>
    %c0_68 = arith.constant 0 : index
    %c0_69 = arith.constant 0 : index
    %132 = vector.load %arg12[%c0_68, %c0_69] : memref<2x32xf32, #tpu.memory_space<vmem>>, vector<2x32xf32>
    tpu.vector_store %arg12[%c0_68, %c0_69], %115 {strides = array<i32>} : memref<2x32xf32, #tpu.memory_space<vmem>>, vector<2x32xf32>,
    %c0_70 = arith.constant 0 : index
    %c0_71 = arith.constant 0 : index
    %133 = vector.load %arg13[%c0_70, %c0_71] : memref<2x32xf32, #tpu.memory_space<vmem>>, vector<2x32xf32>
    tpu.vector_store %arg13[%c0_70, %c0_71], %113 {strides = array<i32>} : memref<2x32xf32, #tpu.memory_space<vmem>>, vector<2x32xf32>,
    %c0_72 = arith.constant 0 : index
    %c0_73 = arith.constant 0 : index
    %134 = vector.load %arg14[%c0_72, %c0_73] : memref<2x8xf32, #tpu.memory_space<vmem>>, vector<2x8xf32>
    tpu.vector_store %arg14[%c0_72, %c0_73], %131 {strides = array<i32>} : memref<2x8xf32, #tpu.memory_space<vmem>>, vector<2x8xf32>,
    %135 = arith.index_cast %82 : i32 to index
    %c0_74 = arith.constant 0 : index
    %c0_75 = arith.constant 0 : index
    %136 = vector.load %arg10[%135, %c0_74, %c0_75] : memref<4x2x8xf32, #tpu.memory_space<vmem>>, vector<1x2x8xf32>
    %137 = vector.shape_cast %136 : vector<1x2x8xf32> to vector<2x8xf32>
    %138 = vector.shape_cast %131 : vector<2x8xf32> to vector<1x2x8xf32>
    tpu.vector_store %arg10[%135, %c0_74, %c0_75], %138 {strides = array<i32>} : memref<4x2x8xf32, #tpu.memory_space<vmem>>, vector<1x2x8xf32>,
    %c2_i32_76 = arith.constant 2 : i32
    %c1_i32_77 = arith.constant 1 : i32
    %139 = arith.muli %c2_i32_76, %c1_i32_77 : i32
    %c0_i32_78 = arith.constant 0 : i32
    %140 = arith.addi %c0_i32_78, %139 : i32
    %c2_i32_79 = arith.constant 2 : i32
    %141 = arith.muli %140, %c2_i32_79 : i32
    %142 = tpu.assume_multiple %141, 2 : i32
    %143 = arith.index_cast %142 : i32 to index
    %c0_80 = arith.constant 0 : index
    %144 = vector.load %arg11[%143, %c0_80] : memref<8x128xf32, #tpu.memory_space<vmem>>, vector<2x128xf32>
    %c0_81 = arith.constant 0 : index
    %c0_82 = arith.constant 0 : index
    %145 = vector.load %arg12[%c0_81, %c0_82] : memref<2x32xf32, #tpu.memory_space<vmem>>, vector<2x32xf32>
    %cst_83 = arith.constant dense<0.000000e+00> : vector<2x128xf32>
    %146 = tpu.matmul %145, %17, %cst_83 {dimension_numbers = #tpu.dot_dimension_numbers<[1], [0], [0], [1], [0, 0, 1, 1], [], []>} : vector<2x32xf32>, vector<32x128xf32>, vector<2x128xf32> -> vector<2x128xf32>
    %147 = arith.addf %144, %146 : vector<2x128xf32>
    %148 = vector.extract_strided_slice %147 {offsets = [0, 0], sizes = [2, 32], strides = [1, 1]} : vector<2x128xf32> to vector<2x32xf32>
    %149 = arith.negf %148 : vector<2x32xf32>
    %150 = math.exp %149 : vector<2x32xf32>
    %cst_84 = arith.constant 1.000000e+00 : f32
    %151 = vector.broadcast %cst_84 : f32 to vector<2x32xf32>
    %152 = arith.addf %151, %150 : vector<2x32xf32>
    %153 = arith.divf %151, %152 : vector<2x32xf32>
    %154 = vector.extract_strided_slice %147 {offsets = [0, 32], sizes = [2, 32], strides = [1, 1]} : vector<2x128xf32> to vector<2x32xf32>
    %155 = arith.negf %154 : vector<2x32xf32>
    %156 = math.exp %155 : vector<2x32xf32>
    %cst_85 = arith.constant 1.000000e+00 : f32
    %157 = vector.broadcast %cst_85 : f32 to vector<2x32xf32>
    %158 = arith.addf %157, %156 : vector<2x32xf32>
    %159 = arith.divf %157, %158 : vector<2x32xf32>
    %160 = vector.extract_strided_slice %147 {offsets = [0, 64], sizes = [2, 32], strides = [1, 1]} : vector<2x128xf32> to vector<2x32xf32>
    %161 = math.tanh %160 : vector<2x32xf32>
    %162 = vector.extract_strided_slice %147 {offsets = [0, 96], sizes = [2, 32], strides = [1, 1]} : vector<2x128xf32> to vector<2x32xf32>
    %163 = arith.negf %162 : vector<2x32xf32>
    %164 = math.exp %163 : vector<2x32xf32>
    %cst_86 = arith.constant 1.000000e+00 : f32
    %165 = vector.broadcast %cst_86 : f32 to vector<2x32xf32>
    %166 = arith.addf %165, %164 : vector<2x32xf32>
    %167 = arith.divf %165, %166 : vector<2x32xf32>
    %c0_87 = arith.constant 0 : index
    %c0_88 = arith.constant 0 : index
    %168 = vector.load %arg13[%c0_87, %c0_88] : memref<2x32xf32, #tpu.memory_space<vmem>>, vector<2x32xf32>
    %169 = arith.mulf %159, %168 : vector<2x32xf32>
    %170 = arith.mulf %153, %161 : vector<2x32xf32>
    %171 = arith.addf %169, %170 : vector<2x32xf32>
    %172 = math.tanh %171 : vector<2x32xf32>
    %173 = arith.mulf %167, %172 : vector<2x32xf32>
    %cst_89 = arith.constant dense<0.000000e+00> : vector<2x8xf32>
    %174 = tpu.matmul %173, %18, %cst_89 {dimension_numbers = #tpu.dot_dimension_numbers<[1], [0], [0], [1], [0, 0, 1, 1], [], []>} : vector<2x32xf32>, vector<32x8xf32>, vector<2x8xf32> -> vector<2x8xf32>
    %c0_90 = arith.constant 0 : index
    %c0_91 = arith.constant 0 : index
    %175 = vector.load %arg14[%c0_90, %c0_91] : memref<2x8xf32, #tpu.memory_space<vmem>>, vector<2x8xf32>
    %cst_92 = arith.constant dense<0.000000e+00> : vector<2x8xf32>
    %176 = tpu.matmul %175, %19, %cst_92 {dimension_numbers = #tpu.dot_dimension_numbers<[1], [0], [0], [1], [0, 0, 1, 1], [], []>} : vector<2x8xf32>, vector<8x8xf32>, vector<2x8xf32> -> vector<2x8xf32>
    %177 = arith.addf %174, %176 : vector<2x8xf32>
    %178 = arith.addf %177, %22 : vector<2x8xf32>
    %cst_93 = arith.constant 2.000000e+01 : f32
    %179 = vector.broadcast %cst_93 : f32 to vector<2x8xf32>
    %180 = arith.cmpf ogt, %178, %179 : vector<2x8xf32>
    %cst_94 = arith.constant 2.000000e+01 : f32
    %181 = vector.broadcast %cst_94 : f32 to vector<2x8xf32>
    %182 = arith.minimumf %178, %181 : vector<2x8xf32>
    %183 = math.exp %182 : vector<2x8xf32>
    %184 = math.log1p %183 : vector<2x8xf32>
    %185 = arith.select %180, %178, %184 : vector<2x8xi1>, vector<2x8xf32>
    %cst_95 = arith.constant dense<0.000000e+00> : vector<2xf32>
    %186 = vector.multi_reduction <add>, %185, %cst_95 [1] : vector<2x8xf32> to vector<2xf32>
    %187 = vector.shape_cast %186 : vector<2xf32> to vector<2x1xf32>
    %188 = vector.broadcast %187 : vector<2x1xf32> to vector<2x8xf32>
    %189 = arith.divf %185, %188 : vector<2x8xf32>
    %c0_96 = arith.constant 0 : index
    %c0_97 = arith.constant 0 : index
    %190 = vector.load %arg12[%c0_96, %c0_97] : memref<2x32xf32, #tpu.memory_space<vmem>>, vector<2x32xf32>
    tpu.vector_store %arg12[%c0_96, %c0_97], %173 {strides = array<i32>} : memref<2x32xf32, #tpu.memory_space<vmem>>, vector<2x32xf32>,
    %c0_98 = arith.constant 0 : index
    %c0_99 = arith.constant 0 : index
    %191 = vector.load %arg13[%c0_98, %c0_99] : memref<2x32xf32, #tpu.memory_space<vmem>>, vector<2x32xf32>
    tpu.vector_store %arg13[%c0_98, %c0_99], %171 {strides = array<i32>} : memref<2x32xf32, #tpu.memory_space<vmem>>, vector<2x32xf32>,
    %c0_100 = arith.constant 0 : index
    %c0_101 = arith.constant 0 : index
    %192 = vector.load %arg14[%c0_100, %c0_101] : memref<2x8xf32, #tpu.memory_space<vmem>>, vector<2x8xf32>
    tpu.vector_store %arg14[%c0_100, %c0_101], %189 {strides = array<i32>} : memref<2x8xf32, #tpu.memory_space<vmem>>, vector<2x8xf32>,
    %193 = arith.index_cast %140 : i32 to index
    %c0_102 = arith.constant 0 : index
    %c0_103 = arith.constant 0 : index
    %194 = vector.load %arg10[%193, %c0_102, %c0_103] : memref<4x2x8xf32, #tpu.memory_space<vmem>>, vector<1x2x8xf32>
    %195 = vector.shape_cast %194 : vector<1x2x8xf32> to vector<2x8xf32>
    %196 = vector.shape_cast %189 : vector<2x8xf32> to vector<1x2x8xf32>
    tpu.vector_store %arg10[%193, %c0_102, %c0_103], %196 {strides = array<i32>} : memref<4x2x8xf32, #tpu.memory_space<vmem>>, vector<1x2x8xf32>,
    %c3_i32 = arith.constant 3 : i32
    %c1_i32_104 = arith.constant 1 : i32
    %197 = arith.muli %c3_i32, %c1_i32_104 : i32
    %c0_i32_105 = arith.constant 0 : i32
    %198 = arith.addi %c0_i32_105, %197 : i32
    %c2_i32_106 = arith.constant 2 : i32
    %199 = arith.muli %198, %c2_i32_106 : i32
    %200 = tpu.assume_multiple %199, 2 : i32
    %201 = arith.index_cast %200 : i32 to index
    %c0_107 = arith.constant 0 : index
    %202 = vector.load %arg11[%201, %c0_107] : memref<8x128xf32, #tpu.memory_space<vmem>>, vector<2x128xf32>
    %c0_108 = arith.constant 0 : index
    %c0_109 = arith.constant 0 : index
    %203 = vector.load %arg12[%c0_108, %c0_109] : memref<2x32xf32, #tpu.memory_space<vmem>>, vector<2x32xf32>
    %cst_110 = arith.constant dense<0.000000e+00> : vector<2x128xf32>
    %204 = tpu.matmul %203, %17, %cst_110 {dimension_numbers = #tpu.dot_dimension_numbers<[1], [0], [0], [1], [0, 0, 1, 1], [], []>} : vector<2x32xf32>, vector<32x128xf32>, vector<2x128xf32> -> vector<2x128xf32>
    %205 = arith.addf %202, %204 : vector<2x128xf32>
    %206 = vector.extract_strided_slice %205 {offsets = [0, 0], sizes = [2, 32], strides = [1, 1]} : vector<2x128xf32> to vector<2x32xf32>
    %207 = arith.negf %206 : vector<2x32xf32>
    %208 = math.exp %207 : vector<2x32xf32>
    %cst_111 = arith.constant 1.000000e+00 : f32
    %209 = vector.broadcast %cst_111 : f32 to vector<2x32xf32>
    %210 = arith.addf %209, %208 : vector<2x32xf32>
    %211 = arith.divf %209, %210 : vector<2x32xf32>
    %212 = vector.extract_strided_slice %205 {offsets = [0, 32], sizes = [2, 32], strides = [1, 1]} : vector<2x128xf32> to vector<2x32xf32>
    %213 = arith.negf %212 : vector<2x32xf32>
    %214 = math.exp %213 : vector<2x32xf32>
    %cst_112 = arith.constant 1.000000e+00 : f32
    %215 = vector.broadcast %cst_112 : f32 to vector<2x32xf32>
    %216 = arith.addf %215, %214 : vector<2x32xf32>
    %217 = arith.divf %215, %216 : vector<2x32xf32>
    %218 = vector.extract_strided_slice %205 {offsets = [0, 64], sizes = [2, 32], strides = [1, 1]} : vector<2x128xf32> to vector<2x32xf32>
    %219 = math.tanh %218 : vector<2x32xf32>
    %220 = vector.extract_strided_slice %205 {offsets = [0, 96], sizes = [2, 32], strides = [1, 1]} : vector<2x128xf32> to vector<2x32xf32>
    %221 = arith.negf %220 : vector<2x32xf32>
    %222 = math.exp %221 : vector<2x32xf32>
    %cst_113 = arith.constant 1.000000e+00 : f32
    %223 = vector.broadcast %cst_113 : f32 to vector<2x32xf32>
    %224 = arith.addf %223, %222 : vector<2x32xf32>
    %225 = arith.divf %223, %224 : vector<2x32xf32>
    %c0_114 = arith.constant 0 : index
    %c0_115 = arith.constant 0 : index
    %226 = vector.load %arg13[%c0_114, %c0_115] : memref<2x32xf32, #tpu.memory_space<vmem>>, vector<2x32xf32>
    %227 = arith.mulf %217, %226 : vector<2x32xf32>
    %228 = arith.mulf %211, %219 : vector<2x32xf32>
    %229 = arith.addf %227, %228 : vector<2x32xf32>
    %230 = math.tanh %229 : vector<2x32xf32>
    %231 = arith.mulf %225, %230 : vector<2x32xf32>
    %cst_116 = arith.constant dense<0.000000e+00> : vector<2x8xf32>
    %232 = tpu.matmul %231, %18, %cst_116 {dimension_numbers = #tpu.dot_dimension_numbers<[1], [0], [0], [1], [0, 0, 1, 1], [], []>} : vector<2x32xf32>, vector<32x8xf32>, vector<2x8xf32> -> vector<2x8xf32>
    %c0_117 = arith.constant 0 : index
    %c0_118 = arith.constant 0 : index
    %233 = vector.load %arg14[%c0_117, %c0_118] : memref<2x8xf32, #tpu.memory_space<vmem>>, vector<2x8xf32>
    %cst_119 = arith.constant dense<0.000000e+00> : vector<2x8xf32>
    %234 = tpu.matmul %233, %19, %cst_119 {dimension_numbers = #tpu.dot_dimension_numbers<[1], [0], [0], [1], [0, 0, 1, 1], [], []>} : vector<2x8xf32>, vector<8x8xf32>, vector<2x8xf32> -> vector<2x8xf32>
    %235 = arith.addf %232, %234 : vector<2x8xf32>
    %236 = arith.addf %235, %22 : vector<2x8xf32>
    %cst_120 = arith.constant 2.000000e+01 : f32
    %237 = vector.broadcast %cst_120 : f32 to vector<2x8xf32>
    %238 = arith.cmpf ogt, %236, %237 : vector<2x8xf32>
    %cst_121 = arith.constant 2.000000e+01 : f32
    %239 = vector.broadcast %cst_121 : f32 to vector<2x8xf32>
    %240 = arith.minimumf %236, %239 : vector<2x8xf32>
    %241 = math.exp %240 : vector<2x8xf32>
    %242 = math.log1p %241 : vector<2x8xf32>
    %243 = arith.select %238, %236, %242 : vector<2x8xi1>, vector<2x8xf32>
    %cst_122 = arith.constant dense<0.000000e+00> : vector<2xf32>
    %244 = vector.multi_reduction <add>, %243, %cst_122 [1] : vector<2x8xf32> to vector<2xf32>
    %245 = vector.shape_cast %244 : vector<2xf32> to vector<2x1xf32>
    %246 = vector.broadcast %245 : vector<2x1xf32> to vector<2x8xf32>
    %247 = arith.divf %243, %246 : vector<2x8xf32>
    %c0_123 = arith.constant 0 : index
    %c0_124 = arith.constant 0 : index
    %248 = vector.load %arg12[%c0_123, %c0_124] : memref<2x32xf32, #tpu.memory_space<vmem>>, vector<2x32xf32>
    tpu.vector_store %arg12[%c0_123, %c0_124], %231 {strides = array<i32>} : memref<2x32xf32, #tpu.memory_space<vmem>>, vector<2x32xf32>,
    %c0_125 = arith.constant 0 : index
    %c0_126 = arith.constant 0 : index
    %249 = vector.load %arg13[%c0_125, %c0_126] : memref<2x32xf32, #tpu.memory_space<vmem>>, vector<2x32xf32>
    tpu.vector_store %arg13[%c0_125, %c0_126], %229 {strides = array<i32>} : memref<2x32xf32, #tpu.memory_space<vmem>>, vector<2x32xf32>,
    %c0_127 = arith.constant 0 : index
    %c0_128 = arith.constant 0 : index
    %250 = vector.load %arg14[%c0_127, %c0_128] : memref<2x8xf32, #tpu.memory_space<vmem>>, vector<2x8xf32>
    tpu.vector_store %arg14[%c0_127, %c0_128], %247 {strides = array<i32>} : memref<2x8xf32, #tpu.memory_space<vmem>>, vector<2x8xf32>,
    %251 = arith.index_cast %198 : i32 to index
    %c0_129 = arith.constant 0 : index
    %c0_130 = arith.constant 0 : index
    %252 = vector.load %arg10[%251, %c0_129, %c0_130] : memref<4x2x8xf32, #tpu.memory_space<vmem>>, vector<1x2x8xf32>
    %253 = vector.shape_cast %252 : vector<1x2x8xf32> to vector<2x8xf32>
    %254 = vector.shape_cast %247 : vector<2x8xf32> to vector<1x2x8xf32>
    tpu.vector_store %arg10[%251, %c0_129, %c0_130], %254 {strides = array<i32>} : memref<4x2x8xf32, #tpu.memory_space<vmem>>, vector<1x2x8xf32>,
    %c4_i32 = arith.constant 4 : i32
    return
  }
  func.func @transform_0(%arg0: i32) -> (i32, i32) {
    %c0_i32 = arith.constant 0 : i32
    %c0_i32_0 = arith.constant 0 : i32
    return %arg0, %c0_i32 : i32, i32
  }
  func.func @transform_1(%arg0: i32) -> (i32, i32) {
    %c0_i32 = arith.constant 0 : i32
    %c0_i32_0 = arith.constant 0 : i32
    %c0_i32_1 = arith.constant 0 : i32
    return %c0_i32, %c0_i32_0 : i32, i32
  }
  func.func @transform_2(%arg0: i32) -> (i32, i32) {
    %c0_i32 = arith.constant 0 : i32
    %c0_i32_0 = arith.constant 0 : i32
    %c0_i32_1 = arith.constant 0 : i32
    return %c0_i32, %c0_i32_0 : i32, i32
  }
  func.func @transform_3(%arg0: i32) -> (i32, i32) {
    %c0_i32 = arith.constant 0 : i32
    %c0_i32_0 = arith.constant 0 : i32
    %c0_i32_1 = arith.constant 0 : i32
    return %c0_i32, %c0_i32_0 : i32, i32
  }
  func.func @transform_4(%arg0: i32) -> (i32, i32) {
    %c0_i32 = arith.constant 0 : i32
    %c0_i32_0 = arith.constant 0 : i32
    %c0_i32_1 = arith.constant 0 : i32
    return %c0_i32, %c0_i32_0 : i32, i32
  }
  func.func @transform_5(%arg0: i32) -> (i32, i32) {
    %c0_i32 = arith.constant 0 : i32
    %c0_i32_0 = arith.constant 0 : i32
    %c0_i32_1 = arith.constant 0 : i32
    return %c0_i32, %c0_i32_0 : i32, i32
  }
  func.func @transform_6(%arg0: i32) -> (i32, i32) {
    %c0_i32 = arith.constant 0 : i32
    %c0_i32_0 = arith.constant 0 : i32
    %c0_i32_1 = arith.constant 0 : i32
    return %c0_i32, %c0_i32_0 : i32, i32
  }
  func.func @transform_7(%arg0: i32) -> (i32, i32) {
    %c0_i32 = arith.constant 0 : i32
    %c0_i32_0 = arith.constant 0 : i32
    %c0_i32_1 = arith.constant 0 : i32
    return %c0_i32, %c0_i32_0 : i32, i32
  }
  func.func @transform_8(%arg0: i32) -> (i32, i32) {
    %c0_i32 = arith.constant 0 : i32
    %c0_i32_0 = arith.constant 0 : i32
    %c0_i32_1 = arith.constant 0 : i32
    return %c0_i32, %c0_i32_0 : i32, i32
  }
  func.func @transform_9(%arg0: i32) -> (i32, i32, i32) {
    %c0_i32 = arith.constant 0 : i32
    %c0_i32_0 = arith.constant 0 : i32
    %c0_i32_1 = arith.constant 0 : i32
    return %arg0, %c0_i32, %c0_i32_0 : i32, i32, i32
  }
}

</mosaic_0001>

<bundles_post_ra>
// kernel: tpu_custom_call.1
= control target key start
LH: loop header
LB: loop body
LE: loop exit
PB: predicated region body
PF: predicated region fallthrough
CT: control target
= control target key end

     0   :  { %14 = vsyncpa [#allocation7], 0  ;;  %s2767_s0 = inlined_call_operand.vmem [shape: f32[16,24], index: 0, kind: input, shape index: {}]   ;;  %s2768_s1 = inlined_call_operand.hbm [shape: f32[24,32], index: 1, kind: input, shape index: {}]   ;;  %s2769_s2 = inlined_call_operand.vmem [shape: f32[1,32], index: 2, kind: input, shape index: {}]   ;;  %s2770_s3 = inlined_call_operand.vmem [shape: f32[32,128], index: 3, kind: input, shape index: {}]   ;;  %s2771_s4 = inlined_call_operand.hbm [shape: f32[32,128], index: 4, kind: input, shape index: {}]   ;;  %s2772_s5 = inlined_call_operand.vmem [shape: f32[1,128], index: 5, kind: input, shape index: {}]   ;;  %s2773_s6 = inlined_call_operand.vmem [shape: f32[32,8], index: 6, kind: input, shape index: {}]   ;;  %s2774_s7 = inlined_call_operand.vmem [shape: f32[8,8], index: 7, kind: input, shape index: {}]   ;;  %s2775_s8 = inlined_call_operand.vmem [shape: f32[1,8], index: 8, kind: input, shape index: {}]   ;;  %s2776_s9 = inlined_call_operand.hbm [shape: f32[8,2,8], index: 9, kind: output, shape index: {}]  }
   0x1   :  { %15 = vsyncpa [#allocation10], 0 }
   0x2   :  { %16 = vsyncpa [#allocation8], 0 }
   0x3   :  { %18 = vsyncpa [#allocation8 + $0x1], 0  ;;  %s2395_s30 = smov 0   ;;  %s2397_s10 = smov 0  }
   0x4   :  { %s2399_s11 = smov 0   ;;  %s2401_s12 = smov 0  }
   0x5 LB: > { %2783 = sst [smem:[#allocation15_spill]] %s2326_s11  ;;  %s2416_s13 = sadd.s32 4294967295, %s2330_s12   ;;  %s2330_s12 = sphi %s2401_s12, %s2798_s12   ;;  %s2326_s11 = sphi %s2399_s11, %s2800_s11   ;;  %s2322_s10 = sphi %s2397_s10, %s2802_s10   ;;  %s2318_s30 = sphi %s2395_s30, %s2801_s30  }
   0x6   : > { %s1795_s14 = sadd.s32 4294967294, %s2330_s12   ;;  %s2420_s15 = sadd.s32 1, %s2330_s12  }
   0x7   : > { %2784 = sst [smem:[#allocation16_spill]] %s2420_s15  ;;  %s225_s16 = sadd.s32 1, %s2326_s11 }
   0x8   : > { %s222_s17 = ssub.s32 %s2330_s12, %s2420_s15  ;;  %p235_p0 = scmp.ne.s32.totalorder %s2326_s11, %s2322_s10 }
   0x9   : > { %p223_p1 = scmp.eq.s32.totalorder %s222_s17, 0  ;;  %p236_p2 = scmp.eq.s32.totalorder %s2416_s13, 1 }
   0xa   : > { %p241_p3 = scmp.ne.s32.totalorder %s2322_s10, %s2318_s30  ;;  %p242_p4 = scmp.eq.s32.totalorder %s1795_s14, 1 }
   0xb   : > { %s2431_s18 = scalar_select %p223_p1, %s2326_s11, %s225_s16  }
   0xc   : > { %p2433_p5 = por %p236_p2, %p235_p0  ;;  %p2437_p6 = por %p242_p4, %p241_p3 }
   0xd   : > { %2785 = sst [smem:[#allocation17_spill]] %s2431_s18  ;;  %p1796_p7 = scmp.ge.s32.totalorder %s2330_s12, 1 }
   0xe   : > { %s2786_s19 = scalar_select %p2433_p5, 1, 0 }
   0xf   : > { %s2787_s20 = scalar_select %p2437_p6, 1, 0 }
  0x10   : > { %p249_p8 = scmp.lt.s32.totalorder %s2330_s12, 3  ;;  %p2777_p10 = scmp.eq.s32.totalorder %s2416_s13, 0 }
  0x11   : > { %s2332_s22 = smov [#allocation6]   ;;  %s2333_s25 = smov [#allocation9]  }
  0x12   : > { %p2445_p11 = pnand %p1796_p7, %p249_p8  ;;  %s261_s23 = sshll.u32 %s2332_s22, 4  ;;  %s262_s23 = int_to_ptr.vmem [resolvable:$true] %s261_s23 }
  0x13   : > { %s280_s26 = sshll.u32 %s2333_s25, 4  ;;  %s2204_s29 = scalar_lea.hbm %s2768_s1, 384  ;;  %s2457_s26 = int_to_ptr.vmem [resolvable:$true] %s280_s26 }
  0x14   : > { %s2788_s21 = scalar_select %p2445_p11, 1, 0 }
  0x15   : > { %p2088_p12 = pneg %p2445_p11  ;;  %p2205_p0 = scmp.ne.s32.totalorder %s2768_s1, %s2204_s29 }
  0x16   : > { %p2211_p4 = scmp.lt.u32.totalorder %s2204_s29, %s2768_s1 }
  0x17   : > { %p2453_p13 = pnand %p2777_p10, %p2088_p12 }
  0x19   : > { %p2206_p1 = pneg %p2453_p13 }
  0x1b   : > { %p2207_p2 = pnand %p2206_p1, %p2205_p0 }
  0x1d   : > { %p2208_p3 = pneg %p2207_p2 }
  0x1f   : > { %p2213_p7 = pnand %p2211_p4, %p2208_p3 }
  0x21   : > { %2216 = shalt.err (!%p2213_p7)
}
  0x22   : > { %s2217_s25 = scalar_lea.vmem %s262_s23, 384  ;;  %p2225_p10 = scmp.lt.s32.totalorder %s262_s23, %s262_s23 }
  0x23   : > { %p2218_p8 = scmp.ne.s32.totalorder %s262_s23, %s2217_s25  ;;  %p2226_p6 = scmp.lt.s32.totalorder %s2217_s25, %s2217_s25 }
  0x25   : > { %p2220_p12 = pnand %p2218_p8, %p2206_p1  ;;  %p2227_p5 = por %p2226_p6, %p2225_p10 }
  0x27   : > { %p2221_p9 = pneg %p2220_p12 }
  0x29   : > { %p2228_p11 = pnand %p2227_p5, %p2221_p9 }
  0x2b   : > { %2231 = shalt.err (!%p2228_p11)
}
  0x2c   : > { %s2334_s27 = smov 128   ;;  %s2335_s28 = smov 8  }
  0x2d   : > { %2091 = dma.hbm_to_vmem [thread:$0]  (!%p2453_p13), %s2768_s1, 384, %s262_s23, [#allocation7], %s2334_s27, %s2334_s27, %s2335_s28  }
  0x2e   : > { %s2232_s22 = scalar_lea.hbm %s2771_s4, 512 }
  0x2f   : > { %p2233_p0 = scmp.ne.s32.totalorder %s2771_s4, %s2232_s22  ;;  %p2239_p9 = scmp.lt.u32.totalorder %s2232_s22, %s2771_s4 }
  0x31   : > { %p2235_p5 = pnand %p2233_p0, %p2206_p1 }
  0x33   : > { %p2236_p6 = pneg %p2235_p5 }
  0x35   : > { %p2241_p10 = pnand %p2239_p9, %p2236_p6 }
  0x37   : > { %2244 = shalt.err (!%p2241_p10)
}
  0x38   : > { %s2245_s23 = scalar_lea.vmem %s2457_s26, 512  ;;  %p2253_p4 = scmp.lt.s32.totalorder %s2457_s26, %s2457_s26 }
  0x39   : > { %p2246_p11 = scmp.ne.s32.totalorder %s2457_s26, %s2245_s23  ;;  %p2254_p7 = scmp.lt.s32.totalorder %s2245_s23, %s2245_s23 }
  0x3b   : > { %p2248_p2 = pnand %p2246_p11, %p2206_p1  ;;  %p2255_p8 = por %p2254_p7, %p2253_p4 }
  0x3d   : > { %p2249_p3 = pneg %p2248_p2 }
  0x3f   : > { %p2256_p12 = pnand %p2255_p8, %p2249_p3 }
  0x41   : > { %2259 = shalt.err (!%p2256_p12)
}
  0x42   : > { %2094 = dma.hbm_to_vmem [thread:$0]  (!%p2453_p13), %s2771_s4, 512, %s2457_s26, [#allocation10], %s2334_s27, %s2334_s27, %s2335_s28  }
  0x43   : > { %p2790_p0 = scmp.ne.s32.totalorder %s2788_s21, 0 }
  0x44   : > { %p2791_p5 = scmp.eq.s32.totalorder (!%p2790_p0), %s2416_s13, 0 }
  0x45   : > { %315 = sbr.rel (%p2790_p0) target bundleno = 3576 (0xdf8), region = 56 }
  0x4c   : > { %2305 = dma.done.wait (%p2791_p5), [#allocation7], 384   ;;  %p2792_p1 = pmov %p2791_p5 }
  0x4e   : > { %2307 = vsyncadd (%p2792_p1), [#allocation7], 4294966912  ;;  %p2793_p6 = pmov %p2792_p1 }
  0x4f   : > { %p2794_p9 = pmov %p2792_p1 }
  0x50   : > { %2309 = dma.done.wait (%p2793_p6), [#allocation10], 512  }
  0x51   : > { %2311 = vsyncadd (%p2794_p9), [#allocation10], 4294966784  ;;  %s351_s18 = sand.u32 1, %s2322_s10   ;;  %p354_p13 = scmp.lt.s32.totalorder %s2416_s13, 1 }
  0x52   : > { %s1803_s21 = sshll.u32 %s351_s18, 3  ;;  %p2795_p10 = scmp.ne.s32.totalorder %s2416_s13, 0 }
  0x53   : > { %s355_s24 = scalar_select %p354_p13, %s2416_s13, 1 }
  0x54   : > { %s2524_s14 = scalar_lea.vmem [#allocation11], %s1803_s21  ;;  %362 = sbr.rel (%p2795_p10) target bundleno = 91 (0x5b), region = 68  ;;  %vm363_vm0 = vcmask (!%p2795_p10), 254976   ;;  %vm366_vm1 = vcmask (!%p2795_p10), 58368   ;;  %v2336_v0 = vmov (!%p2795_p10), 0.0  }
  0x55   : > { %s1804_s26 = sshll.u32 %s355_s24, 3  ;;  %364 = vst.msk [vmem:[#allocation3] sm:$0x3] (!%p2795_p10), %vm363_vm0, %v2336_v0  ;;  %365 = vst.msk [vmem:[#allocation4] sm:$0x3] (!%p2795_p10), %vm363_vm0, %v2336_v0 }
  0x56   : > { %s357_s29 = scalar_lea.vmem %s2767_s0, %s1804_s26  ;;  %367 = vst.msk [vmem:[#allocation5] sm:$0x3] (!%p2795_p10), %vm366_vm1, %v2336_v0 }
  0x5b PF: > { %v369_v1 = vld [vmem:[#allocation6] sm:$0xff]  ;;  %v370_v2 = vld [vmem:[#allocation6 + $0x8] sm:$0xff]  ;;  %v2337_v3 = vmov 0.0|0.0   ;;  %vm2338_vm2 = vmmov 0   ;;  %v2339_v5 = vmov 0.0   ;;  %v454_v6 = vld [vmem:[%s2770_s3] sm:$0xff] }
  0x5c   : > { %2021 = vmatprep.subr.bf16.mxu0 %v2337_v3  ;;  %v2022_v4 = vpack.c.bf16 %v370_v2, %v369_v1  ;;  %1899 = vmatprep.mubr.msk.f32.mxu0 %vm2338_vm2, %v2339_v5  ;;  %v455_v7 = vld [vmem:[%s2770_s3 + $0x8] sm:$0xff]  ;;  %v371_v9 = vld [vmem:[#allocation6 + $0x10] sm:$0xff]  ;;  %vm379_vm3 = vcmask 195584   ;;  %v456_v11 = vld [vmem:[%s2770_s3 + $0x10] sm:$0xff]  ;;  %vm465_vm4 = vcmask 261120   ;;  %s2341_s16 = smov 32  }
  0x5d   : > { %2024 = vmatprep.subr.bf16.mxu1 %v2337_v3  ;;  %v2025_v8 = vpack.c.bf16 %v455_v7, %v454_v6  ;;  %1910 = vmatprep.mubr.msk.f32.mxu1 %vm2338_vm2, %v2339_v5  ;;  %v368_v10 = vld [vmem:[%s357_s29] sm:$0xff]  ;;  %v457_v12 = vld [vmem:[%s2770_s3 + $0x18] sm:$0xff]  ;;  %v541_v15 = vld [vmem:[#allocation9 + $0x8] sm:$0xff]  ;;  %s2340_s29 = smov 64   ;;  %vm662_vm5 = vcmask 64512   ;;  %s2342_s28 = smov 96  }
  0x5e   : > { %2023 = vmatpush3.bf16.msra.mxu0 %v2022_v4  ;;  %v2028_v13 = vpack.c.bf16 %v457_v12, %v456_v11  ;;  %v540_v14 = vld [vmem:[#allocation9] sm:$0xff]  ;;  %v542_v17 = vld [vmem:[#allocation9 + $0x10] sm:$0xff]  ;;  %v543_v18 = vld [vmem:[#allocation9 + $0x18] sm:$0xff]  ;;  %vm833_vm6 = vcmask 254976   ;;  %vm826_vm9 = vcmask 58368   ;;  %s1711_s25 = sshll.u32 %s2524_s14, 4  ;;  %s2717_s25 = int_to_ptr.vmem [resolvable:$true] %s1711_s25 }
  0x5f   : > { %1897 = vmatprep.subr.mxu0 %v2339_v5  ;;  %2026 = vmatpush3.bf16.msra.mxu1 %v2025_v8  ;;  %v2552_v16 = vpack.c.bf16 %v541_v15, %v540_v14  ;;  %v2555_v19 = vpack.c.bf16 %v543_v18, %v542_v17  ;;  %v557_v20 = vld [vmem:[#allocation3] sm:$0x3]  ;;  %v1806_v21 = vld [vmem:[%s2769_s2] ss:$0 sm:$0xff]  ;;  %v639_v35 = vld [vmem:[#allocation4] sm:$0x3] }
  0x60   : > { %2027 = vmatprep.subr.bf16.mxu1 %v2337_v3  ;;  %v1808_v28 = vld [vmem:[%s2772_s5] ss:$0 sm:$0xff]  ;;  %v661_v48 = vld [vmem:[#allocation5] sm:$0x3]  ;;  %v546_v51 = vld [vmem:[%s2773_s6 + $0x10] sm:$0xff]  ;;  %s2724_s21 = scalar_lea.sflag [#allocation8], %s351_s18 }
  0x61   : > { %v2582_v47 = vld [vmem:[%s2774_s7] sm:$0xff]  ;;  %v545_v50 = vld [vmem:[%s2773_s6 + $0x8] sm:$0xff]  ;;  %v547_v52 = vld [vmem:[%s2773_s6 + $0x18] sm:$0xff]  ;;  %p2796_p2 = scmp.ne.s32.totalorder %s2786_s19, 0  ;;  %s2343_s24 = smov [#allocation11]  }
  0x62   : > { %1898 = vmatpush3.msra.mxu0 %v371_v9  ;;  %v544_v49 = vld [vmem:[%s2773_s6] sm:$0xff]  ;;  %v2605_v54 = vpack.c.bf16 %v547_v52, %v546_v51  ;;  %s2264_s26 = sshll.u32 %s2343_s24, 4  ;;  %s2265_s26 = int_to_ptr.vmem [resolvable:$false] %s2264_s26 }
  0x63   : > { %1900 = vmatmul.mubr.msk.f32.vlgmr.msra.gmra.mrb[0].mxu0 %vm379_vm3, %v368_v10  ;;  %2030 = vmatprep.subr.bf16.mxu0 %v2337_v3  ;;  %v2600_v53 = vpack.c.bf16 %v545_v50, %v544_v49  ;;  %v2631_v10 = vld [vmem:[%s2775_s8] ss:$0 sm:$0xff]  ;;  %s2266_s27 = scalar_lea.vmem %s2265_s26, 256  ;;  %p2267_p7 = scmp.lt.s32.totalorder %s2717_s25, %s2265_s26 }
  0x64   : > { %1921 = vmatprep.mubr.msk.f32.mxu0 %vm2338_vm2, %v2339_v5  ;;  %2029 = vmatpush3.bf16.msra.mxu1 %v2028_v13 }
  0x65   : > { %1924 = vmatprep.subr.mxu1 %v2339_v5  ;;  %2032 = vmatpush3.bf16.msra.mxu0 %v2552_v16 }
  0x66   : > { %2033 = vmatprep.subr.bf16.mxu0 %v2337_v3 }
  0x69   : > { %2035 = vmatpush3.bf16.msra.mxu0 %v2555_v19 }
  0x6a   : > { %2042 = vmatprep.subr.bf16.mxu0 %v2337_v3 }
  0x6c   : > { %1922 = vmatmul.mubr.msk.f32.vlgmr.msra.gmra.mrb[2].mxu0 %vm465_vm4, %v557_v20 }
  0x6d   : > { %2044 = vmatpush3.bf16.msra.mxu0 %v2552_v16  ;;  %1948 = vmatprep.mubr.msk.f32.mxu0 %vm2338_vm2, %v2339_v5 }
  0x6e   : > { %2045 = vmatprep.subr.bf16.mxu0 %v2337_v3 }
  0x71   : > { %2047 = vmatpush3.bf16.msra.mxu0 %v2555_v19 }
  0x72   : > { %2048 = vmatprep.subr.bf16.mxu0 %v2337_v3 }
 0x136   : > { %v449_v22 = vpop.f32.mrb[0].mxu0 }
 0x137   : > { %v450_v23 = vadd.f32 %v1806_v21, %v449_v22  ;;  %v1901_v24 = vpop.f32.mrb[1].mxu0 }
 0x139   : > { %v453_v25 = vmax.f32 %v450_v23, 0.0 }
 0x13b   : > { %1911 = vmatmul.mubr.msk.f32.vlgmr.msra.gmra.mrb[0].mxu1 %vm465_vm4, %v453_v25 }
 0x13c   : > { %1926 = vmatprep.mubr.msk.f32.mxu1 %vm2338_vm2, %v2339_v5  ;;  %1925 = vmatpush3.msra.mxu1 %v2582_v47 }
 0x13d   : > { %2036 = vmatprep.subr.bf16.mxu1 %v2337_v3 }
 0x13f   : > { %v627_v26 = vpop.f32.mrb[2].mxu0  ;;  %1927 = vmatmul.mubr.msk.f32.vlgmr.msra.gmra.mrb[2].mxu1 %vm662_vm5, %v661_v48 }
 0x140   : > { %v1923_v27 = vpop.f32.mrb[3].mxu0  ;;  %1937 = vmatprep.mubr.msk.f32.mxu1 %vm2338_vm2, %v2339_v5  ;;  %2038 = vmatpush3.bf16.msra.mxu1 %v2600_v53 }
 0x141   : > { %2039 = vmatprep.subr.bf16.mxu1 %v2337_v3 }
 0x144   : > { %2041 = vmatpush3.bf16.msra.mxu1 %v2605_v54 }
 0x145   : > { %1951 = vmatprep.subr.mxu1 %v2339_v5 }
 0x20e   : > { %v535_v29 = vpop.f32.mrb[0].mxu1 }
 0x20f   : > { %v536_v30 = vadd.f32 %v1808_v28, %v535_v29  ;;  %v1912_v31 = vpop.f32.mrb[1].mxu1 }
 0x211   : > { %539 = vst [vmem:[#allocation2] sm:$0xff] %v536_v30 }
 0x212   : > { %v732_v59 = vpop.f32.mrb[2].mxu1 }
 0x213   : > { %v1928_v60 = vpop.f32.mrb[3].mxu1 }
 0x218   : > { %v556_v32 = vld [vmem:[#allocation2] sm:$0x3]  ;;  %v843_v2 = vld [vmem:[#allocation2 + $0x2] sm:$0x3]  ;;  %v1128_v51 = vld [vmem:[#allocation2 + $0x4] sm:$0x3] }
 0x219   : > { %v631_v33 = vadd.f32 %v627_v26, %v556_v32 }
 0x21b   : > { %2148 = vtanh.f32 %v631_v33  ;;  %v1812_v36 = vmul.f32 -1.442695, %v631_v33 }
 0x21d   : > { %2150 = vpow2.f32 %v1812_v36 }
 0x225   : > { %v2149_v34 = vpop.eup %2148 }
 0x226   : > { %646 = vrot.lane.b32.xlu0 %v2149_v34, %s2340_s29 }
 0x227   : > { %v2151_v37 = vpop.eup %2150 }
 0x228   : > { %v635_v38 = vadd.f32 1.0, %v2151_v37 }
 0x22a   : > { %641 = vrot.lane.b32.xlu0 %v639_v35, %s2341_s16  ;;  %2152 = vrcp.f32 %v635_v38 }
 0x234   : > { %v2153_v39 = vpop.eup %2152 }
 0x298   : > { %v647_v40 = vpop.permute.xlu0 %646 }
 0x299   : > { %v649_v41 = vmul.f32 %v2153_v39, %v647_v40 }
 0x29b   : > { %651 = vrot.lane.b32.xlu1 %v649_v41, %s2341_s16 }
 0x29c   : > { %v642_v42 = vpop.permute.xlu0 %641 }
 0x29d   : > { %v644_v43 = vmul.f32 %v2153_v39, %v642_v42 }
 0x30d   : > { %v652_v44 = vpop.permute.xlu1 %651 }
 0x30e   : > { %v654_v45 = vadd.f32 %v652_v44, %v644_v43 }
 0x310   : > { %2154 = vtanh.f32 %v654_v45 }
 0x31a   : > { %v2155_v46 = vpop.eup %2154 }
 0x31b   : > { %657 = vrot.lane.b32.xlu1 %v2155_v46, %s2340_s29 }
 0x31f   : > { %836 = vrot.lane.b32.xlu1 %v654_v45, %s2342_s28 }
 0x38d   : > { %v658_v55 = vpop.permute.xlu1 %657 }
 0x38e   : > { %v660_v56 = vmul.f32 %v2153_v39, %v658_v55 }
 0x390   : > { %737 = vrot.lane.b32.xlu0 %v660_v56, %s2341_s16 }
 0x391   : > { %v837_v57 = vpop.permute.xlu1 %836 }
 0x392   : > { %839 = vst.msk [vmem:[#allocation4] sm:$0x3] %vm833_vm6, %v837_v57 }
 0x399   : > { %v926_v58 = vld [vmem:[#allocation4] sm:$0x3] }
 0x39a   : > { %928 = vrot.lane.b32.xlu1 %v926_v58, %s2341_s16 }
 0x402   : > { %v738_v61 = vpop.permute.xlu0 %737 }
 0x403   : > { %834 = vst.msk [vmem:[#allocation3] sm:$0x3] %vm833_vm6, %v738_v61  ;;  %1938 = vmatmul.mubr.msk.f32.vlgmr.msra.gmra.mrb[4].mxu1 %vm465_vm4, %v738_v61 }
 0x404   : > { %1952 = vmatpush3.msra.mxu1 %v2582_v47  ;;  %1953 = vmatprep.mubr.msk.f32.mxu1 %vm2338_vm2, %v2339_v5 }
 0x405   : > { %2054 = vmatprep.subr.bf16.mxu1 %v2337_v3 }
 0x40a   : > { %v844_v62 = vld [vmem:[#allocation3] sm:$0x3] }
 0x40b   : > { %1949 = vmatmul.mubr.msk.f32.vlgmr.msra.gmra.mrb[4].mxu0 %vm465_vm4, %v844_v62 }
 0x40c   : > { %2050 = vmatpush3.bf16.msra.mxu0 %v2600_v53  ;;  %1964 = vmatprep.mubr.msk.f32.mxu0 %vm2338_vm2, %v2339_v5  ;;  %v929_v32 = vpop.permute.xlu1 %928 }
 0x40d   : > { %2051 = vmatprep.subr.bf16.mxu0 %v2337_v3 }
 0x410   : > { %2053 = vmatpush3.bf16.msra.mxu0 %v2605_v54 }
 0x411   : > { %2066 = vmatprep.subr.bf16.mxu0 %v2337_v3 }
 0x4d6   : > { %v807_v63 = vpop.f32.mrb[4].mxu1 }
 0x4d7   : > { %v808_v0 = vadd.f32 %v807_v63, %v732_v59  ;;  %v1939_v1 = vpop.f32.mrb[5].mxu1 }
 0x4d9   : > { %v811_v11 = vadd.f32 %v2631_v10, %v808_v0 }
 0x4db   : > { %v813_v13 = vmin.f32 %v811_v11, 20.0  ;;  %vm812_vm8 = vcmp.gt.f32.partialorder %v811_v11, 20.0 }
 0x4dd   : > { %v814_v15 = vmul.f32 1.442695, %v813_v13 }
 0x4de   : > { %v914_v4 = vpop.f32.mrb[4].mxu0 }
 0x4df   : > { %v918_v6 = vadd.f32 %v914_v4, %v843_v2  ;;  %v1950_v7 = vpop.f32.mrb[5].mxu0 }
 0x4e1   : > { %2156 = vtanh.f32 %v918_v6  ;;  %v1816_v9 = vmul.f32 -1.442695, %v918_v6 }
 0x4e3   : > { %2158 = vpow2.f32 %v1816_v9 }
 0x4eb   : > { %v2157_v8 = vpop.eup %2156 }
 0x4ec   : > { %933 = vrot.lane.b32.xlu0 %v2157_v8, %s2340_s29 }
 0x4ed   : > { %v2159_v12 = vpop.eup %2158 }
 0x4ee   : > { %v922_v14 = vadd.f32 1.0, %v2159_v12 }
 0x4f0   : > { %2160 = vrcp.f32 %v922_v14 }
 0x4f1   : > { %2162 = vpow2.f32 %v814_v15 }
 0x4fa   : > { %v2161_v17 = vpop.eup %2160 }
 0x4fb   : > { %v2163_v21 = vpop.eup %2162  ;;  %v931_v33 = vmul.f32 %v2161_v17, %v929_v32 }
 0x4fc   : > { %v816_v22 = vadd.f32 1.0, %v2163_v21  ;;  %v819_v23 = vmul.f32 -0.5, %v2163_v21  ;;  %v822_v26 = vand.u32 2147483647, %v2163_v21 }
 0x4fe   : > { %2164 = vlog2.f32 %v816_v22  ;;  %v820_v25 = vadd.f32 1.0, %v819_v23  ;;  %vm823_vm7 = vcmp.lt.f32.partialorder %v822_v26, 0.0004427343 }
 0x500   : > { %v821_v28 = vmul.f32 %v2163_v21, %v820_v25 }
 0x508   : > { %v2165_v24 = vpop.eup %2164 }
 0x509   : > { %v818_v27 = vmul.f32 0.6931472, %v2165_v24 }
 0x50b   : > { %v824_v29 = vsel %vm823_vm7, %v821_v28, %v818_v27 }
 0x50c   : > { %v825_v30 = vsel %vm812_vm8, %v811_v11, %v824_v29 }
 0x50d   : > { %v827_v31 = vsel %vm826_vm9, %v825_v30, 0.0 }
 0x55e   : > { %v934_v18 = vpop.permute.xlu0 %933 }
 0x55f   : > { %v936_v20 = vmul.f32 %v2161_v17, %v934_v18 }
 0x561   : > { %938 = vrot.lane.b32.xlu0 %v936_v20, %s2341_s16 }
 0x580   : > { %828 = vadd.xlane.f32.xlu0 %v827_v31 }
 0x5d3   : > { %v939_v34 = vpop.permute.xlu0 %938 }
 0x5d4   : > { %v941_v35 = vadd.f32 %v939_v34, %v931_v33  ;;  %v1413_v33 = vld [vmem:[#allocation2 + $0x6] sm:$0x3] }
 0x5d6   : > { %2166 = vtanh.f32 %v941_v35 }
 0x5e0   : > { %v2167_v36 = vpop.eup %2166 }
 0x5e1   : > { %944 = vrot.lane.b32.xlu1 %v2167_v36, %s2340_s29 }
 0x60d   : > { %v829_v37 = vpop.xlane.xlu0 %828 }
 0x60e   : > { %2168 = vrcp.f32 %v829_v37 }
 0x618   : > { %v2169_v38 = vpop.eup %2168 }
 0x619   : > { %v831_v39 = vmul.f32 %v2169_v38, %v825_v30 }
 0x61b   : > { %840 = vst.msk [vmem:[#allocation5] sm:$0x3] %vm826_vm9, %v831_v39  ;;  %841 = vst.msk [vmem:[%s2524_s14] sm:$0x3] %vm826_vm9, %v831_v39 }
 0x622   : > { %v948_v40 = vld [vmem:[#allocation5] sm:$0x3] }
 0x623   : > { %1954 = vmatmul.mubr.msk.f32.vlgmr.msra.gmra.mrb[6].mxu1 %vm662_vm5, %v948_v40 }
 0x624   : > { %2056 = vmatpush3.bf16.msra.mxu1 %v2552_v16  ;;  %1975 = vmatprep.mubr.msk.f32.mxu1 %vm2338_vm2, %v2339_v5 }
 0x625   : > { %2057 = vmatprep.subr.bf16.mxu1 %v2337_v3 }
 0x628   : > { %2059 = vmatpush3.bf16.msra.mxu1 %v2555_v19 }
 0x629   : > { %1978 = vmatprep.subr.mxu1 %v2339_v5 }
 0x653   : > { %v945_v41 = vpop.permute.xlu1 %944 }
 0x654   : > { %v947_v42 = vmul.f32 %v2161_v17, %v945_v41 }
 0x656   : > { %1023 = vrot.lane.b32.xlu1 %v947_v42, %s2341_s16 }
 0x65a   : > { %1120 = vrot.lane.b32.xlu1 %v941_v35, %s2342_s28 }
 0x6c8   : > { %v1024_v43 = vpop.permute.xlu1 %1023 }
 0x6c9   : > { %1118 = vst.msk [vmem:[#allocation3] sm:$0x3] %vm833_vm6, %v1024_v43  ;;  %1965 = vmatmul.mubr.msk.f32.vlgmr.msra.gmra.mrb[6].mxu0 %vm465_vm4, %v1024_v43 }
 0x6ca   : > { %2068 = vmatpush3.bf16.msra.mxu0 %v2552_v16  ;;  %2002 = vmatprep.mubr.msk.f32.mxu0 %vm2338_vm2, %v2339_v5 }
 0x6cb   : > { %2069 = vmatprep.subr.bf16.mxu0 %v2337_v3 }
 0x6cc   : > { %v1121_v44 = vpop.permute.xlu1 %1120 }
 0x6cd   : > { %1123 = vst.msk [vmem:[#allocation4] sm:$0x3] %vm833_vm6, %v1121_v44 }
 0x6ce   : > { %2071 = vmatpush3.bf16.msra.mxu0 %v2555_v19 }
 0x6cf   : > { %2072 = vmatprep.subr.bf16.mxu0 %v2337_v3 }
 0x6d0   : > { %v1129_v45 = vld [vmem:[#allocation3] sm:$0x3] }
 0x6d1   : > { %1976 = vmatmul.mubr.msk.f32.vlgmr.msra.gmra.mrb[8].mxu1 %vm465_vm4, %v1129_v45 }
 0x6d2   : > { %1979 = vmatpush3.msra.mxu1 %v2582_v47  ;;  %1980 = vmatprep.mubr.msk.f32.mxu1 %vm2338_vm2, %v2339_v5 }
 0x6d3   : > { %2060 = vmatprep.subr.bf16.mxu1 %v2337_v3 }
 0x6d4   : > { %v1211_v57 = vld [vmem:[#allocation4] sm:$0x3] }
 0x6f6   : > { %v1018_v16 = vpop.f32.mrb[6].mxu1 }
 0x6f7   : > { %v1955_v46 = vpop.f32.mrb[7].mxu1 }
 0x79c   : > { %v1093_v48 = vpop.f32.mrb[6].mxu0 }
 0x79d   : > { %v1094_v49 = vadd.f32 %v1093_v48, %v1018_v16  ;;  %v1966_v50 = vpop.f32.mrb[7].mxu0 }
 0x79f   : > { %v1097_v7 = vadd.f32 %v2631_v10, %v1094_v49 }
 0x7a1   : > { %v1099_v9 = vmin.f32 %v1097_v7, 20.0  ;;  %vm1098_vm11 = vcmp.gt.f32.partialorder %v1097_v7, 20.0 }
 0x7a3   : > { %v1100_v11 = vmul.f32 1.442695, %v1099_v9 }
 0x7a4   : > { %v1199_v52 = vpop.f32.mrb[8].mxu1 }
 0x7a5   : > { %v1203_v19 = vadd.f32 %v1199_v52, %v1128_v51  ;;  %v1977_v55 = vpop.f32.mrb[9].mxu1 }
 0x7a7   : > { %2170 = vtanh.f32 %v1203_v19  ;;  %v1821_v58 = vmul.f32 -1.442695, %v1203_v19 }
 0x7a9   : > { %2172 = vpow2.f32 %v1821_v58 }
 0x7b1   : > { %v2171_v56 = vpop.eup %2170 }
 0x7b2   : > { %1218 = vrot.lane.b32.xlu1 %v2171_v56, %s2340_s29 }
 0x7b3   : > { %v2173_v59 = vpop.eup %2172 }
 0x7b4   : > { %v1207_v60 = vadd.f32 1.0, %v2173_v59 }
 0x7b6   : > { %1213 = vrot.lane.b32.xlu1 %v1211_v57, %s2341_s16  ;;  %2174 = vrcp.f32 %v1207_v60 }
 0x7c0   : > { %v2175_v61 = vpop.eup %2174 }
 0x824   : > { %v1219_v62 = vpop.permute.xlu1 %1218 }
 0x825   : > { %v1221_v63 = vmul.f32 %v2175_v61, %v1219_v62 }
 0x827   : > { %1223 = vrot.lane.b32.xlu1 %v1221_v63, %s2341_s16 }
 0x828   : > { %v1214_v0 = vpop.permute.xlu1 %1213 }
 0x829   : > { %v1216_v1 = vmul.f32 %v2175_v61, %v1214_v0 }
 0x899   : > { %v1224_v2 = vpop.permute.xlu1 %1223 }
 0x89a   : > { %v1226_v4 = vadd.f32 %v1224_v2, %v1216_v1 }
 0x89c   : > { %2176 = vtanh.f32 %v1226_v4  ;;  %1405 = vrot.lane.b32.xlu0 %v1226_v4, %s2342_s28 }
 0x89d   : > { %2178 = vpow2.f32 %v1100_v11 }
 0x8a6   : > { %v2177_v6 = vpop.eup %2176 }
 0x8a7   : > { %1229 = vrot.lane.b32.xlu1 %v2177_v6, %s2340_s29  ;;  %v2179_v14 = vpop.eup %2178 }
 0x8a8   : > { %v1102_v15 = vadd.f32 1.0, %v2179_v14  ;;  %v1105_v17 = vmul.f32 -0.5, %v2179_v14  ;;  %v1108_v21 = vand.u32 2147483647, %v2179_v14 }
 0x8aa   : > { %2180 = vlog2.f32 %v1102_v15  ;;  %v1106_v20 = vadd.f32 1.0, %v1105_v17  ;;  %vm1109_vm10 = vcmp.lt.f32.partialorder %v1108_v21, 0.0004427343 }
 0x8ac   : > { %v1107_v23 = vmul.f32 %v2179_v14, %v1106_v20 }
 0x8b4   : > { %v2181_v18 = vpop.eup %2180 }
 0x8b5   : > { %v1104_v22 = vmul.f32 0.6931472, %v2181_v18 }
 0x8b7   : > { %v1110_v24 = vsel %vm1109_vm10, %v1107_v23, %v1104_v22 }
 0x8b8   : > { %v1111_v25 = vsel %vm1098_vm11, %v1097_v7, %v1110_v24 }
 0x8b9   : > { %v1112_v26 = vsel %vm826_vm9, %v1111_v25, 0.0 }
 0x90e   : > { %v1406_v8 = vpop.permute.xlu0 %1405 }
 0x90f   : > { %1408 = vst.msk [vmem:[#allocation4] sm:$0x3] %vm833_vm6, %v1406_v8 }
 0x919   : > { %v1230_v12 = vpop.permute.xlu1 %1229 }
 0x91a   : > { %v1232_v13 = vmul.f32 %v2175_v61, %v1230_v12 }
 0x91c   : > { %1308 = vrot.lane.b32.xlu1 %v1232_v13, %s2341_s16 }
 0x940   : > { %1113 = vadd.xlane.f32.xlu1 %v1112_v26 }
 0x98e   : > { %v1309_v27 = vpop.permute.xlu1 %1308 }
 0x98f   : > { %1403 = vst.msk [vmem:[#allocation3] sm:$0x3] %vm833_vm6, %v1309_v27 }
 0x996   : > { %v1414_v28 = vld [vmem:[#allocation3] sm:$0x3] }
 0x997   : > { %2003 = vmatmul.mubr.msk.f32.vlgmr.msra.gmra.mrb[8].mxu0 %vm465_vm4, %v1414_v28 }
 0x998   : > { %2074 = vmatpush3.bf16.msra.mxu0 %v2600_v53  ;;  %2018 = vmatprep.mubr.msk.f32.mxu0 %vm2338_vm2, %v2339_v5 }
 0x999   : > { %2075 = vmatprep.subr.bf16.mxu0 %v2337_v3 }
 0x99c   : > { %2077 = vmatpush3.bf16.msra.mxu0 %v2605_v54 }
 0x9cd   : > { %v1114_v29 = vpop.xlane.xlu1 %1113 }
 0x9ce   : > { %2182 = vrcp.f32 %v1114_v29 }
 0x9d8   : > { %v2183_v30 = vpop.eup %2182 }
 0x9d9   : > { %v1116_v31 = vmul.f32 %v2183_v30, %v1111_v25 }
 0x9db   : > { %1124 = vst.msk [vmem:[#allocation5] sm:$0x3] %vm826_vm9, %v1116_v31  ;;  %1819 = vst.msk [vmem:[%s2524_s14 + $0x2] sm:$0x3] %vm826_vm9, %v1116_v31 }
 0x9e2   : > { %v1233_v32 = vld [vmem:[#allocation5] sm:$0x3] }
 0x9e3   : > { %1981 = vmatmul.mubr.msk.f32.vlgmr.msra.gmra.mrb[10].mxu1 %vm662_vm5, %v1233_v32 }
 0x9e4   : > { %2062 = vmatpush3.bf16.msra.mxu1 %v2600_v53  ;;  %1991 = vmatprep.mubr.msk.f32.mxu1 %vm2338_vm2, %v2339_v5 }
 0x9e5   : > { %2063 = vmatprep.subr.bf16.mxu1 %v2337_v3  ;;  %v1496_v3 = vld [vmem:[#allocation4] sm:$0x3] }
 0x9e8   : > { %2065 = vmatpush3.bf16.msra.mxu1 %v2605_v54 }
 0x9e9   : > { %2005 = vmatprep.subr.mxu1 %v2339_v5 }
 0x9eb   : > { %1992 = vmatmul.mubr.msk.f32.vlgmr.msra.gmra.mrb[12].mxu1 %vm465_vm4, %v1309_v27 }
 0x9ec   : > { %2006 = vmatpush3.msra.mxu1 %v2582_v47  ;;  %2007 = vmatprep.mubr.msk.f32.mxu1 %vm2338_vm2, %v2339_v5 }
 0xa6a   : > { %v1484_v34 = vpop.f32.mrb[8].mxu0 }
 0xa6b   : > { %v1488_v35 = vadd.f32 %v1484_v34, %v1413_v33  ;;  %v2004_v53 = vpop.f32.mrb[9].mxu0 }
 0xa6d   : > { %2184 = vtanh.f32 %v1488_v35  ;;  %v1826_v47 = vmul.f32 -1.442695, %v1488_v35 }
 0xa6f   : > { %2186 = vpow2.f32 %v1826_v47 }
 0xa77   : > { %v2185_v36 = vpop.eup %2184 }
 0xa78   : > { %1503 = vrot.lane.b32.xlu0 %v2185_v36, %s2340_s29 }
 0xa79   : > { %v2187_v41 = vpop.eup %2186 }
 0xa7a   : > { %v1492_v43 = vadd.f32 1.0, %v2187_v41 }
 0xa7c   : > { %1498 = vrot.lane.b32.xlu0 %v1496_v3, %s2341_s16  ;;  %2188 = vrcp.f32 %v1492_v43 }
 0xa86   : > { %v2189_v45 = vpop.eup %2188 }
 0xab6   : > { %v1303_v54 = vpop.f32.mrb[10].mxu1 }
 0xab7   : > { %v1982_v37 = vpop.f32.mrb[11].mxu1 }
 0xabe   : > { %v1378_v38 = vpop.f32.mrb[12].mxu1 }
 0xabf   : > { %v1379_v39 = vadd.f32 %v1378_v38, %v1303_v54  ;;  %v1993_v40 = vpop.f32.mrb[13].mxu1 }
 0xac1   : > { %v1382_v5 = vadd.f32 %v2631_v10, %v1379_v39 }
 0xac3   : > { %v1384_v42 = vmin.f32 %v1382_v5, 20.0  ;;  %vm1383_vm13 = vcmp.gt.f32.partialorder %v1382_v5, 20.0 }
 0xac5   : > { %v1385_v44 = vmul.f32 1.442695, %v1384_v42 }
 0xac7   : > { %2190 = vpow2.f32 %v1385_v44 }
 0xad1   : > { %v2191_v48 = vpop.eup %2190 }
 0xad2   : > { %v1387_v49 = vadd.f32 1.0, %v2191_v48  ;;  %v1390_v50 = vmul.f32 -0.5, %v2191_v48  ;;  %v1393_v19 = vand.u32 2147483647, %v2191_v48 }
 0xad4   : > { %2192 = vlog2.f32 %v1387_v49  ;;  %v1391_v52 = vadd.f32 1.0, %v1390_v50  ;;  %vm1394_vm12 = vcmp.lt.f32.partialorder %v1393_v19, 0.0004427343 }
 0xad6   : > { %v1392_v56 = vmul.f32 %v2191_v48, %v1391_v52 }
 0xade   : > { %v2193_v51 = vpop.eup %2192 }
 0xadf   : > { %v1389_v55 = vmul.f32 0.6931472, %v2193_v51 }
 0xae1   : > { %v1395_v57 = vsel %vm1394_vm12, %v1392_v56, %v1389_v55 }
 0xae2   : > { %v1396_v58 = vsel %vm1383_vm13, %v1382_v5, %v1395_v57 }
 0xae3   : > { %v1397_v59 = vsel %vm826_vm9, %v1396_v58, 0.0 }
 0xaea   : > { %v1504_v16 = vpop.permute.xlu0 %1503 }
 0xaeb   : > { %v1506_v46 = vmul.f32 %v2189_v45, %v1504_v16 }
 0xaed   : > { %1508 = vrot.lane.b32.xlu0 %v1506_v46, %s2341_s16 }
 0xaee   : > { %v1499_v60 = vpop.permute.xlu0 %1498 }
 0xaef   : > { %v1501_v61 = vmul.f32 %v2189_v45, %v1499_v60 }
 0xb0c   : > { %1398 = vadd.xlane.f32.xlu0 %v1397_v59 }
 0xb5f   : > { %v1509_v62 = vpop.permute.xlu0 %1508 }
 0xb60   : > { %v1511_v63 = vadd.f32 %v1509_v62, %v1501_v61 }
 0xb62   : > { %2194 = vtanh.f32 %v1511_v63  ;;  %1690 = vrot.lane.b32.xlu0 %v1511_v63, %s2342_s28 }
 0xb6c   : > { %v2195_v0 = vpop.eup %2194 }
 0xb6d   : > { %1514 = vrot.lane.b32.xlu1 %v2195_v0, %s2340_s29  ;;  %s1835_s29 = sshll.u32 %s2416_s13, 7  ;;  %s2260_s13 = scalar_lea.vmem %s2717_s25, 128 }
 0xb6e   : > { %s2715_s15 = scalar_lea.hbm %s2776_s9, %s1835_s29  ;;  %p2261_p11 = scmp.ne.s32.totalorder %s2717_s25, %s2260_s13 }
 0xb6f   : > { %p2268_p8 = scmp.lt.s32.totalorder %s2266_s27, %s2260_s13 }
 0xb70   : > { %p2262_p3 = pnand %p2261_p11, %p2796_p2 }
 0xb71   : > { %p2269_p12 = por %p2268_p8, %p2267_p7 }
 0xb72   : > { %p2263_p4 = pneg %p2262_p3 }
 0xb74   : > { %p2270_p0 = pnand %p2269_p12, %p2263_p4 }
 0xb99   : > { %v1399_v1 = vpop.xlane.xlu0 %1398 }
 0xb9a   : > { %2196 = vrcp.f32 %v1399_v1 }
 0xba4   : > { %v2197_v2 = vpop.eup %2196 }
 0xba5   : > { %v1401_v4 = vmul.f32 %v2197_v2, %v1396_v58 }
 0xba7   : > { %1409 = vst.msk [vmem:[#allocation5] sm:$0x3] %vm826_vm9, %v1401_v4  ;;  %1824 = vst.msk [vmem:[%s2524_s14 + $0x4] sm:$0x3] %vm826_vm9, %v1401_v4 }
 0xbae   : > { %v1518_v6 = vld [vmem:[#allocation5] sm:$0x3] }
 0xbaf   : > { %2008 = vmatmul.mubr.msk.f32.vlgmr.msra.gmra.mrb[14].mxu1 %vm662_vm5, %v1518_v6 }
 0xbd4   : > { %v1691_v7 = vpop.permute.xlu0 %1690 }
 0xbd5   : > { %1693 = vst.msk [vmem:[#allocation4] sm:$0x3] %vm833_vm6, %v1691_v7 }
 0xbdf   : > { %v1515_v8 = vpop.permute.xlu1 %1514 }
 0xbe0   : > { %v1517_v9 = vmul.f32 %v2189_v45, %v1515_v8 }
 0xbe2   : > { %1593 = vrot.lane.b32.xlu1 %v1517_v9, %s2341_s16 }
 0xc54   : > { %v1594_v11 = vpop.permute.xlu1 %1593 }
 0xc55   : > { %1688 = vst.msk [vmem:[#allocation3] sm:$0x3] %vm833_vm6, %v1594_v11  ;;  %2019 = vmatmul.mubr.msk.f32.vlgmr.msra.gmra.mrb[10].mxu0 %vm465_vm4, %v1594_v11 }
 0xc82   : > { %v1588_v12 = vpop.f32.mrb[14].mxu1 }
 0xc83   : > { %v2009_v13 = vpop.f32.mrb[15].mxu1 }
 0xd28   : > { %v1663_v14 = vpop.f32.mrb[10].mxu0 }
 0xd29   : > { %v1664_v15 = vadd.f32 %v1663_v14, %v1588_v12  ;;  %v2020_v17 = vpop.f32.mrb[11].mxu0 }
 0xd2b   : > { %v1667_v18 = vadd.f32 %v2631_v10, %v1664_v15 }
 0xd2d   : > { %v1669_v20 = vmin.f32 %v1667_v18, 20.0  ;;  %vm1668_vm15 = vcmp.gt.f32.partialorder %v1667_v18, 20.0 }
 0xd2f   : > { %v1670_v21 = vmul.f32 1.442695, %v1669_v20 }
 0xd31   : > { %2198 = vpow2.f32 %v1670_v21 }
 0xd3b   : > { %v2199_v22 = vpop.eup %2198 }
 0xd3c   : > { %v1672_v23 = vadd.f32 1.0, %v2199_v22  ;;  %v1675_v24 = vmul.f32 -0.5, %v2199_v22  ;;  %v1678_v26 = vand.u32 2147483647, %v2199_v22 }
 0xd3e   : > { %2200 = vlog2.f32 %v1672_v23  ;;  %v1676_v25 = vadd.f32 1.0, %v1675_v24  ;;  %vm1679_vm14 = vcmp.lt.f32.partialorder %v1678_v26, 0.0004427343 }
 0xd40   : > { %v1677_v29 = vmul.f32 %v2199_v22, %v1676_v25 }
 0xd48   : > { %v2201_v27 = vpop.eup %2200 }
 0xd49   : > { %v1674_v28 = vmul.f32 0.6931472, %v2201_v27 }
 0xd4b   : > { %v1680_v30 = vsel %vm1679_vm14, %v1677_v29, %v1674_v28 }
 0xd4c   : > { %v1681_v10 = vsel %vm1668_vm15, %v1667_v18, %v1680_v30 }
 0xd4d   : > { %v1682_v31 = vsel %vm826_vm9, %v1681_v10, 0.0 }
 0xd4e   : > { %1683 = vadd.xlane.f32.xlu1 %v1682_v31 }
 0xddb   : > { %v1684_v32 = vpop.xlane.xlu1 %1683 }
 0xddc   : > { %2202 = vrcp.f32 %v1684_v32 }
 0xde6   : > { %v2203_v33 = vpop.eup %2202 }
 0xde7   : > { %v1686_v34 = vmul.f32 %v2203_v33, %v1681_v10 }
 0xde9   : > { %1694 = vst.msk [vmem:[#allocation5] sm:$0x3] %vm826_vm9, %v1686_v34  ;;  %1829 = vst.msk [vmem:[%s2524_s14 + $0x6] sm:$0x3] %vm826_vm9, %v1686_v34 }
 0xdea   : > { %2273 = shalt.err (!%p2270_p0)
}
 0xdeb   : > { %s2274_s18 = scalar_lea.hbm %s2715_s15, 128  ;;  %s2278_s17 = scalar_lea.hbm %s2776_s9, 256 }
 0xdec   : > { %p2275_p5 = scmp.ne.s32.totalorder %s2715_s15, %s2274_s18  ;;  %p2279_p9 = scmp.lt.u32.totalorder %s2715_s15, %s2776_s9 }
 0xded   : > { %p2280_p13 = scmp.lt.u32.totalorder %s2278_s17, %s2274_s18  ;;  %p2282_p11 = scmp.lt.u32.totalorder %s2274_s18, %s2715_s15 }
 0xdee   : > { %p2276_p1 = pnand %p2275_p5, %p2796_p2 }
 0xdef   : > { %p2281_p10 = por %p2280_p13, %p2279_p9 }
 0xdf0   : > { %p2277_p6 = pneg %p2276_p1 }
 0xdf1   : > { %p2283_p3 = por %p2282_p11, %p2281_p10 }
 0xdf3   : > { %p2284_p4 = pnand %p2283_p3, %p2277_p6 }
 0xdf5   : > { %2287 = shalt.err (!%p2284_p4)
}
 0xdf6   : > { %s2344_s23 = smov 2  }
 0xdf7   : > { %2086 = dma.vmem_to_hbm [thread:$0]  (%p2796_p2), %s2717_s25, 128, %s2715_s15, %s2724_s21, %s2341_s16, %s2341_s16, %s2344_s23  }
 0xdf8 PF: > { %p2103_p7 = scmp.ge.s32.totalorder %s2330_s12, 2  ;;  %s1726_s11 = sand.u32 1, %s2318_s30  }
 0xdf9   : > { %p2797_p8 = scmp.ne.s32.totalorder %s2787_s20, 0  ;;  %s1727_s13 = scalar_lea.sflag [#allocation8], %s1726_s11 }
 0xdfb   : > { %p2096_p12 = pnand %p2103_p7, %p2797_p8 }
 0xdfd   : > { %2313 = dma.done.wait (!%p2096_p12), %s1727_s13, 128  }
 0xdfe   : > { %2315 = vsyncadd (!%p2096_p12), %s1727_s13, 4294967168  ;;  %s2798_s12 = sld [smem:[#allocation16_spill]]  ;;  %s2799_s19 = sld [smem:[#allocation15_spill]] }
 0xdff   : > { %s2800_s11 = sld [smem:[#allocation17_spill]]  ;;  %s2801_s30 = smov %s2322_s10 }
 0xe04   : > { %p21_p0 = scmp.ge.s32.totalorder %s2798_s12, 4   ;;  %s2802_s10 = smov %s2799_s19 }
 0xe06   :  { %23 = sbr.rel (!%p21_p0) target bundleno = 5 (0x5), region = 110 }
 0xe0d   :  { %1732 = vsyncpa [#allocation7], 1 }
 0xe0e   :  { %1734 = vsyncpa [#allocation7 + $0x1], 1 }
 0xe0f   :  { %1735 = vsyncpa [#allocation10], 1 }
 0xe10   :  { %1736 = vsyncpa [#allocation8], 1 }
 0xe11   :  { %1738 = vsyncpa [#allocation8 + $0x1], 1 }

</bundles_post_ra>
